<compile_context>
chip_gen: v5e
topology: v5e:2x2
jax: 0.10.0
libtpu: 0.0.40
codegen_flags: <defaults>
</compile_context>

<pallas_src>
import functools

import jax
import jax.numpy as jnp
from jax import lax
from jax.experimental import pallas as pl
from jax.experimental.pallas import tpu as pltpu

EMBED_DIM = 16
IN_DIM = 2 * EMBED_DIM   # 32
H1 = 16
H2 = 8
LANE = 128


def _round_up(x, m):
    return (x + m - 1) // m * m


def ncf_fused_kernel(uidx_ref, iidx_ref, embu_t_ref, embi_t_ref,
                     w1u_ref, w1i_ref, b1_ref, w2_ref, b2_ref, w3_ref, b3_ref,
                     o_ref):
    """Fused NCF forward for one batch tile (batch on lanes, features on sublanes)."""
    tile = o_ref.shape[-1]
    uidx = uidx_ref[0]                      # (1, tile) int32
    iidx = iidx_ref[0]                      # (1, tile) int32

    nu = embu_t_ref.shape[1]                # padded user-table rows (lane multiple)
    ni = embi_t_ref.shape[1]                # padded item-table rows (lane multiple)

    # --- embedding gather via one-hot matmul (rows are exactly 0/1) ------------
    # one_hot[r, b] = (idx[b] == r)   ->   emb^T = table^T @ one_hot : (16, tile)
    u_oh = jnp.where(lax.broadcasted_iota(jnp.int32, (nu, tile), 0) == uidx,
                     1.0, 0.0).astype(jnp.float32)
    i_oh = jnp.where(lax.broadcasted_iota(jnp.int32, (ni, tile), 0) == iidx,
                     1.0, 0.0).astype(jnp.float32)
    ut = jnp.dot(embu_t_ref[...], u_oh, preferred_element_type=jnp.float32)   # (16, tile)
    it = jnp.dot(embi_t_ref[...], i_oh, preferred_element_type=jnp.float32)   # (16, tile)

    # --- fc1 on the implicit concat: W1 = [W1u | W1i] => W1u@u^T + W1i@i^T -----
    h1 = (jnp.dot(w1u_ref[...], ut, preferred_element_type=jnp.float32)
          + jnp.dot(w1i_ref[...], it, preferred_element_type=jnp.float32)
          + b1_ref[...])
    h1 = jnp.maximum(h1, 0.0)                                                  # (16, tile)

    # --- fc2 -------------------------------------------------------------------
    h2 = jnp.dot(w2_ref[...], h1, preferred_element_type=jnp.float32) + b2_ref[...]
    h2 = jnp.maximum(h2, 0.0)                                                  # (8, tile)

    # --- fc3 (out_features = 1): VPU multiply + sublane reduce, lane-dense -----
    h3 = jnp.sum(w3_ref[...] * h2, axis=0, keepdims=True) + b3_ref[...]        # (1, tile)

    # --- sigmoid (exp on the EUP) ----------------------------------------------
    o_ref[0] = 1.0 / (1.0 + jnp.exp(-h3))


def ncf_forward(user_indices, item_indices, params, *, tile_b=512):
    """Full NCF forward, fully fused into one Pallas kernel, tiled over the batch."""
    B = int(user_indices.shape[0])
    tile = max(LANE, min(tile_b, _round_up(B, LANE)))   # lane-dense tile, <= tile_b
    b_pad = _round_up(B, tile)
    num_tiles = b_pad // tile

    def prep_idx(idx):
        idx = jnp.asarray(idx, jnp.int32)
        idx = jnp.pad(idx, (0, b_pad - B))               # pad with valid index 0
        return idx.reshape(num_tiles, 1, tile)

    u_idx = prep_idx(user_indices)
    i_idx = prep_idx(item_indices)

    # Tables: pad rows to a lane multiple and transpose to (16, rows_pad).
    # (Tiny one-off prep; in production the tables would be stored this way.)
    emb_u = params["embedding_user"]
    emb_i = params["embedding_item"]
    nu_pad = _round_up(emb_u.shape[0], LANE)
    ni_pad = _round_up(emb_i.shape[0], LANE)
    emb_u_t = jnp.pad(emb_u, ((0, nu_pad - emb_u.shape[0]), (0, 0))).T   # (16, nu_pad)
    emb_i_t = jnp.pad(emb_i, ((0, ni_pad - emb_i.shape[0]), (0, 0))).T   # (16, ni_pad)

    # Weights are in PyTorch nn.Linear layout (out_features, in_features); in the
    # transposed (features-on-sublanes) kernel layout that is exactly what we need.
    w1 = params["w1"]                      # (16, 32)
    w1u = w1[:, :EMBED_DIM]                # (16, 16) acts on user embedding
    w1i = w1[:, EMBED_DIM:]                # (16, 16) acts on item embedding
    b1 = params["b1"].reshape(H1, 1)
    w2 = params["w2"]                      # (8, 16)
    b2 = params["b2"].reshape(H2, 1)
    w3 = params["w3"].reshape(H2, 1)       # (1, 8) -> (8, 1) column
    b3 = params["b3"].reshape(1, 1)

    full2d = lambda i: (0, 0)
    tile_map = lambda i: (i, 0, 0)

    out = pl.pallas_call(
        ncf_fused_kernel,
        out_shape=jax.ShapeDtypeStruct((num_tiles, 1, tile), jnp.float32),
        grid_spec=pltpu.PrefetchScalarGridSpec(
            num_scalar_prefetch=0,
            grid=(num_tiles,),
            in_specs=[
                pl.BlockSpec((1, 1, tile), tile_map),          # user indices
                pl.BlockSpec((1, 1, tile), tile_map),          # item indices
                pl.BlockSpec((EMBED_DIM, nu_pad), full2d),     # user table^T (VMEM-resident)
                pl.BlockSpec((EMBED_DIM, ni_pad), full2d),     # item table^T (VMEM-resident)
                pl.BlockSpec((H1, EMBED_DIM), full2d),         # w1 (user half)
                pl.BlockSpec((H1, EMBED_DIM), full2d),         # w1 (item half)
                pl.BlockSpec((H1, 1), full2d),                 # b1
                pl.BlockSpec((H2, H1), full2d),                # w2
                pl.BlockSpec((H2, 1), full2d),                 # b2
                pl.BlockSpec((H2, 1), full2d),                 # w3 column
                pl.BlockSpec((1, 1), full2d),                  # b3
            ],
            out_specs=pl.BlockSpec((1, 1, tile), tile_map),    # lane-dense output
        ),
        compiler_params=pltpu.CompilerParams(
            dimension_semantics=("parallel",),                 # batch tiles independent
        ),
    )(u_idx, i_idx, emb_u_t, emb_i_t, w1u, w1i, b1, w2, b2, w3, b3)

    return out.reshape(b_pad)[:B]                              # (B,)  (== out.squeeze())


def init_params(key, num_users, num_items):
    """Deterministic synthetic parameters; nn.Linear layout (out_features, in_features)."""
    ks = jax.random.split(key, 8)
    scale = 0.1
    return {
        "embedding_user": scale * jax.random.normal(ks[0], (num_users, EMBED_DIM), jnp.float32),
        "embedding_item": scale * jax.random.normal(ks[1], (num_items, EMBED_DIM), jnp.float32),
        "w1": scale * jax.random.normal(ks[2], (H1, IN_DIM), jnp.float32),
        "b1": scale * jax.random.normal(ks[3], (H1,), jnp.float32),
        "w2": scale * jax.random.normal(ks[4], (H2, H1), jnp.float32),
        "b2": scale * jax.random.normal(ks[5], (H2,), jnp.float32),
        "w3": scale * jax.random.normal(ks[6], (1, H2), jnp.float32),
        "b3": scale * jax.random.normal(ks[7], (1,), jnp.float32),
    }


def _reference(user_indices, item_indices, params):
    """Pure-JAX reference matching the PyTorch module (full-f32 matmul precision)."""
    hi = lax.Precision.HIGHEST
    u = jnp.take(params["embedding_user"], user_indices, axis=0)
    it = jnp.take(params["embedding_item"], item_indices, axis=0)
    v = jnp.concatenate([u, it], axis=-1)
    x = jnp.maximum(jnp.dot(v, params["w1"].T, precision=hi) + params["b1"], 0.0)
    x = jnp.maximum(jnp.dot(x, params["w2"].T, precision=hi) + params["b2"], 0.0)
    x = jnp.dot(x, params["w3"].T, precision=hi) + params["b3"]
    return jnp.squeeze(jax.nn.sigmoid(x), axis=-1)


if __name__ == "__main__":
    key = jax.random.PRNGKey(0)
    k_param, k_user, k_item = jax.random.split(key, 3)

    num_users = 100
    num_items = 200
    batch = 1000   # deliberately NOT a multiple of the tile -> exercises padding + 2 tiles

    params = init_params(k_param, num_users, num_items)
    user_indices = jax.random.randint(k_user, (batch,), 0, num_users, dtype=jnp.int32)
    item_indices = jax.random.randint(k_item, (batch,), 0, num_items, dtype=jnp.int32)

    fwd = jax.jit(functools.partial(ncf_forward, tile_b=512))
    out = fwd(user_indices, item_indices, params)
    out = jax.block_until_ready(out)

    ref = _reference(user_indices, item_indices, params)
    assert out.shape == (batch,), out.shape
    # Tolerance accounts for possible reduced-precision (bf16-pass) MXU matmuls;
    # any semantic bug produces errors orders of magnitude larger than this.
    max_err = float(jnp.max(jnp.abs(out - ref)))
    assert max_err < 2e-3, max_err

    print("KERNEL_OK")
</pallas_src>

<mosaic_0001>
module attributes {stable_mosaic.version = 11 : i64} {
  func.func @ncf_fused_kernel(%arg0: i32, %arg1: memref<1x1x512xi32, #tpu.memory_space<vmem>>, %arg2: memref<1x1x512xi32, #tpu.memory_space<vmem>>, %arg3: memref<16x128xf32, #tpu.memory_space<vmem>>, %arg4: memref<16x256xf32, #tpu.memory_space<vmem>>, %arg5: memref<16x16xf32, #tpu.memory_space<vmem>>, %arg6: memref<16x16xf32, #tpu.memory_space<vmem>>, %arg7: memref<16x1xf32, #tpu.memory_space<vmem>>, %arg8: memref<8x16xf32, #tpu.memory_space<vmem>>, %arg9: memref<8x1xf32, #tpu.memory_space<vmem>>, %arg10: memref<8x1xf32, #tpu.memory_space<vmem>>, %arg11: memref<1x1xf32, #tpu.memory_space<vmem>>, %arg12: memref<1x1x512xf32, #tpu.memory_space<vmem>>) attributes {dimension_semantics = [#tpu.dimension_semantics<parallel>], iteration_bounds = array<i64: 2>, scalar_prefetch = 0 : i64, scratch_operands = 0 : i64, tpu.core_type = #tpu.core_type<tc>, window_params = [{transform_indices = @transform_0, window_bounds = array<i64: 1, 1, 512>}, {transform_indices = @transform_1, window_bounds = array<i64: 1, 1, 512>}, {pipeline_mode = #tpu.pipeline_mode<synchronous>, transform_indices = @transform_2, window_bounds = array<i64: 16, 128>}, {pipeline_mode = #tpu.pipeline_mode<synchronous>, transform_indices = @transform_3, window_bounds = array<i64: 16, 256>}, {pipeline_mode = #tpu.pipeline_mode<synchronous>, transform_indices = @transform_4, window_bounds = array<i64: 16, 16>}, {pipeline_mode = #tpu.pipeline_mode<synchronous>, transform_indices = @transform_5, window_bounds = array<i64: 16, 16>}, {pipeline_mode = #tpu.pipeline_mode<synchronous>, transform_indices = @transform_6, window_bounds = array<i64: 16, 1>}, {pipeline_mode = #tpu.pipeline_mode<synchronous>, transform_indices = @transform_7, window_bounds = array<i64: 8, 16>}, {pipeline_mode = #tpu.pipeline_mode<synchronous>, transform_indices = @transform_8, window_bounds = array<i64: 8, 1>}, {pipeline_mode = #tpu.pipeline_mode<synchronous>, transform_indices = @transform_9, window_bounds = array<i64: 8, 1>}, {pipeline_mode = #tpu.pipeline_mode<synchronous>, transform_indices = @transform_10, window_bounds = array<i64: 1, 1>}, {transform_indices = @transform_11, window_bounds = array<i64: 1, 1, 512>}]} {
    %c0 = arith.constant 0 : index
    %c0_0 = arith.constant 0 : index
    %c0_1 = arith.constant 0 : index
    %0 = vector.load %arg1[%c0, %c0_0, %c0_1] : memref<1x1x512xi32, #tpu.memory_space<vmem>>, vector<1x1x512xi32>
    %1 = vector.shape_cast %0 : vector<1x1x512xi32> to vector<1x512xi32>
    %c0_2 = arith.constant 0 : index
    %c0_3 = arith.constant 0 : index
    %c0_4 = arith.constant 0 : index
    %2 = vector.load %arg2[%c0_2, %c0_3, %c0_4] : memref<1x1x512xi32, #tpu.memory_space<vmem>>, vector<1x1x512xi32>
    %3 = vector.shape_cast %2 : vector<1x1x512xi32> to vector<1x512xi32>
    %4 = tpu.iota {dimensions = array<i32: 0>} : vector<128x512xi32>
    %5 = vector.broadcast %1 : vector<1x512xi32> to vector<128x512xi32>
    %6 = arith.cmpi eq, %4, %5 : vector<128x512xi32>
    %cst = arith.constant 1.000000e+00 : f32
    %cst_5 = arith.constant 0.000000e+00 : f32
    %7 = vector.broadcast %cst : f32 to vector<128x512xf32>
    %8 = vector.broadcast %cst_5 : f32 to vector<128x512xf32>
    %9 = arith.select %6, %7, %8 : vector<128x512xi1>, vector<128x512xf32>
    %10 = tpu.iota {dimensions = array<i32: 0>} : vector<256x512xi32>
    %11 = vector.broadcast %3 : vector<1x512xi32> to vector<256x512xi32>
    %12 = arith.cmpi eq, %10, %11 : vector<256x512xi32>
    %cst_6 = arith.constant 1.000000e+00 : f32
    %cst_7 = arith.constant 0.000000e+00 : f32
    %13 = vector.broadcast %cst_6 : f32 to vector<256x512xf32>
    %14 = vector.broadcast %cst_7 : f32 to vector<256x512xf32>
    %15 = arith.select %12, %13, %14 : vector<256x512xi1>, vector<256x512xf32>
    %c0_8 = arith.constant 0 : index
    %c0_9 = arith.constant 0 : index
    %16 = vector.load %arg3[%c0_8, %c0_9] : memref<16x128xf32, #tpu.memory_space<vmem>>, vector<16x128xf32>
    %cst_10 = arith.constant dense<0.000000e+00> : vector<16x512xf32>
    %17 = tpu.matmul %16, %9, %cst_10 {dimension_numbers = #tpu.dot_dimension_numbers<[1], [0], [0], [1], [0, 0, 1, 1], [], []>} : vector<16x128xf32>, vector<128x512xf32>, vector<16x512xf32> -> vector<16x512xf32>
    %c0_11 = arith.constant 0 : index
    %c0_12 = arith.constant 0 : index
    %18 = vector.load %arg4[%c0_11, %c0_12] : memref<16x256xf32, #tpu.memory_space<vmem>>, vector<16x256xf32>
    %cst_13 = arith.constant dense<0.000000e+00> : vector<16x512xf32>
    %19 = tpu.matmul %18, %15, %cst_13 {dimension_numbers = #tpu.dot_dimension_numbers<[1], [0], [0], [1], [0, 0, 1, 1], [], []>} : vector<16x256xf32>, vector<256x512xf32>, vector<16x512xf32> -> vector<16x512xf32>
    %c0_14 = arith.constant 0 : index
    %c0_15 = arith.constant 0 : index
    %20 = vector.load %arg5[%c0_14, %c0_15] : memref<16x16xf32, #tpu.memory_space<vmem>>, vector<16x16xf32>
    %cst_16 = arith.constant dense<0.000000e+00> : vector<16x512xf32>
    %21 = tpu.matmul %20, %17, %cst_16 {dimension_numbers = #tpu.dot_dimension_numbers<[1], [0], [0], [1], [0, 0, 1, 1], [], []>} : vector<16x16xf32>, vector<16x512xf32>, vector<16x512xf32> -> vector<16x512xf32>
    %c0_17 = arith.constant 0 : index
    %c0_18 = arith.constant 0 : index
    %22 = vector.load %arg6[%c0_17, %c0_18] : memref<16x16xf32, #tpu.memory_space<vmem>>, vector<16x16xf32>
    %cst_19 = arith.constant dense<0.000000e+00> : vector<16x512xf32>
    %23 = tpu.matmul %22, %19, %cst_19 {dimension_numbers = #tpu.dot_dimension_numbers<[1], [0], [0], [1], [0, 0, 1, 1], [], []>} : vector<16x16xf32>, vector<16x512xf32>, vector<16x512xf32> -> vector<16x512xf32>
    %24 = arith.addf %21, %23 : vector<16x512xf32>
    %c0_20 = arith.constant 0 : index
    %c0_21 = arith.constant 0 : index
    %25 = vector.load %arg7[%c0_20, %c0_21] : memref<16x1xf32, #tpu.memory_space<vmem>>, vector<16x1xf32>
    %26 = vector.broadcast %25 : vector<16x1xf32> to vector<16x512xf32>
    %27 = arith.addf %24, %26 : vector<16x512xf32>
    %cst_22 = arith.constant 0.000000e+00 : f32
    %28 = vector.broadcast %cst_22 : f32 to vector<16x512xf32>
    %29 = arith.maximumf %27, %28 : vector<16x512xf32>
    %c0_23 = arith.constant 0 : index
    %c0_24 = arith.constant 0 : index
    %30 = vector.load %arg8[%c0_23, %c0_24] : memref<8x16xf32, #tpu.memory_space<vmem>>, vector<8x16xf32>
    %cst_25 = arith.constant dense<0.000000e+00> : vector<8x512xf32>
    %31 = tpu.matmul %30, %29, %cst_25 {dimension_numbers = #tpu.dot_dimension_numbers<[1], [0], [0], [1], [0, 0, 1, 1], [], []>} : vector<8x16xf32>, vector<16x512xf32>, vector<8x512xf32> -> vector<8x512xf32>
    %c0_26 = arith.constant 0 : index
    %c0_27 = arith.constant 0 : index
    %32 = vector.load %arg9[%c0_26, %c0_27] : memref<8x1xf32, #tpu.memory_space<vmem>>, vector<8x1xf32>
    %33 = vector.broadcast %32 : vector<8x1xf32> to vector<8x512xf32>
    %34 = arith.addf %31, %33 : vector<8x512xf32>
    %cst_28 = arith.constant 0.000000e+00 : f32
    %35 = vector.broadcast %cst_28 : f32 to vector<8x512xf32>
    %36 = arith.maximumf %34, %35 : vector<8x512xf32>
    %c0_29 = arith.constant 0 : index
    %c0_30 = arith.constant 0 : index
    %37 = vector.load %arg10[%c0_29, %c0_30] : memref<8x1xf32, #tpu.memory_space<vmem>>, vector<8x1xf32>
    %38 = vector.broadcast %37 : vector<8x1xf32> to vector<8x512xf32>
    %39 = arith.mulf %38, %36 : vector<8x512xf32>
    %cst_31 = arith.constant dense<0.000000e+00> : vector<512xf32>
    %40 = vector.multi_reduction <add>, %39, %cst_31 [0] : vector<8x512xf32> to vector<512xf32>
    %41 = vector.shape_cast %40 : vector<512xf32> to vector<1x512xf32>
    %c0_32 = arith.constant 0 : index
    %c0_33 = arith.constant 0 : index
    %42 = vector.load %arg11[%c0_32, %c0_33] : memref<1x1xf32, #tpu.memory_space<vmem>>, vector<1x1xf32>
    %43 = vector.broadcast %42 : vector<1x1xf32> to vector<1x512xf32>
    %44 = arith.addf %41, %43 : vector<1x512xf32>
    %cst_34 = arith.constant 0.000000e+00 : f32
    %45 = vector.broadcast %cst_34 : f32 to vector<1x512xf32>
    %46 = arith.subf %45, %44 : vector<1x512xf32>
    %47 = math.exp %46 : vector<1x512xf32>
    %cst_35 = arith.constant 1.000000e+00 : f32
    %48 = vector.broadcast %cst_35 : f32 to vector<1x512xf32>
    %49 = arith.addf %48, %47 : vector<1x512xf32>
    %cst_36 = arith.constant 1.000000e+00 : f32
    %50 = vector.broadcast %cst_36 : f32 to vector<1x512xf32>
    %51 = arith.divf %50, %49 : vector<1x512xf32>
    %c0_37 = arith.constant 0 : index
    %c0_38 = arith.constant 0 : index
    %c0_39 = arith.constant 0 : index
    %52 = vector.load %arg12[%c0_37, %c0_38, %c0_39] : memref<1x1x512xf32, #tpu.memory_space<vmem>>, vector<1x1x512xf32>
    %53 = vector.shape_cast %52 : vector<1x1x512xf32> to vector<1x512xf32>
    %54 = vector.shape_cast %51 : vector<1x512xf32> to vector<1x1x512xf32>
    tpu.vector_store %arg12[%c0_37, %c0_38, %c0_39], %54 {strides = array<i32>} : memref<1x1x512xf32, #tpu.memory_space<vmem>>, vector<1x1x512xf32>,
    return
  }
  func.func @transform_0(%arg0: i32) -> (i32, i32, i32) {
    %c0_i32 = arith.constant 0 : i32
    %c0_i32_0 = arith.constant 0 : i32
    %c0_i32_1 = arith.constant 0 : i32
    return %arg0, %c0_i32, %c0_i32_0 : i32, i32, i32
  }
  func.func @transform_1(%arg0: i32) -> (i32, i32, i32) {
    %c0_i32 = arith.constant 0 : i32
    %c0_i32_0 = arith.constant 0 : i32
    %c0_i32_1 = arith.constant 0 : i32
    return %arg0, %c0_i32, %c0_i32_0 : i32, i32, i32
  }
  func.func @transform_2(%arg0: i32) -> (i32, i32) {
    %c0_i32 = arith.constant 0 : i32
    %c0_i32_0 = arith.constant 0 : i32
    %c0_i32_1 = arith.constant 0 : i32
    return %c0_i32, %c0_i32_0 : i32, i32
  }
  func.func @transform_3(%arg0: i32) -> (i32, i32) {
    %c0_i32 = arith.constant 0 : i32
    %c0_i32_0 = arith.constant 0 : i32
    %c0_i32_1 = arith.constant 0 : i32
    return %c0_i32, %c0_i32_0 : i32, i32
  }
  func.func @transform_4(%arg0: i32) -> (i32, i32) {
    %c0_i32 = arith.constant 0 : i32
    %c0_i32_0 = arith.constant 0 : i32
    %c0_i32_1 = arith.constant 0 : i32
    return %c0_i32, %c0_i32_0 : i32, i32
  }
  func.func @transform_5(%arg0: i32) -> (i32, i32) {
    %c0_i32 = arith.constant 0 : i32
    %c0_i32_0 = arith.constant 0 : i32
    %c0_i32_1 = arith.constant 0 : i32
    return %c0_i32, %c0_i32_0 : i32, i32
  }
  func.func @transform_6(%arg0: i32) -> (i32, i32) {
    %c0_i32 = arith.constant 0 : i32
    %c0_i32_0 = arith.constant 0 : i32
    %c0_i32_1 = arith.constant 0 : i32
    return %c0_i32, %c0_i32_0 : i32, i32
  }
  func.func @transform_7(%arg0: i32) -> (i32, i32) {
    %c0_i32 = arith.constant 0 : i32
    %c0_i32_0 = arith.constant 0 : i32
    %c0_i32_1 = arith.constant 0 : i32
    return %c0_i32, %c0_i32_0 : i32, i32
  }
  func.func @transform_8(%arg0: i32) -> (i32, i32) {
    %c0_i32 = arith.constant 0 : i32
    %c0_i32_0 = arith.constant 0 : i32
    %c0_i32_1 = arith.constant 0 : i32
    return %c0_i32, %c0_i32_0 : i32, i32
  }
  func.func @transform_9(%arg0: i32) -> (i32, i32) {
    %c0_i32 = arith.constant 0 : i32
    %c0_i32_0 = arith.constant 0 : i32
    %c0_i32_1 = arith.constant 0 : i32
    return %c0_i32, %c0_i32_0 : i32, i32
  }
  func.func @transform_10(%arg0: i32) -> (i32, i32) {
    %c0_i32 = arith.constant 0 : i32
    %c0_i32_0 = arith.constant 0 : i32
    %c0_i32_1 = arith.constant 0 : i32
    return %c0_i32, %c0_i32_0 : i32, i32
  }
  func.func @transform_11(%arg0: i32) -> (i32, i32, i32) {
    %c0_i32 = arith.constant 0 : i32
    %c0_i32_0 = arith.constant 0 : i32
    %c0_i32_1 = arith.constant 0 : i32
    return %arg0, %c0_i32, %c0_i32_0 : i32, i32, i32
  }
}

</mosaic_0001>

<bundles_post_ra>
// kernel: ncf_forward.1
= control target key start
LH: loop header
LB: loop body
LE: loop exit
PB: predicated region body
PF: predicated region fallthrough
CT: control target
= control target key end

     0   :  { %s2992_s0 = inlined_call_operand.vmem [shape: s32[2,1,512], index: 0, kind: input, shape index: {}]   ;;  %s2993_s1 = inlined_call_operand.vmem [shape: s32[2,1,512], index: 1, kind: input, shape index: {}]   ;;  %s2994_s2 = inlined_call_operand.vmem [shape: f32[16,128], index: 2, kind: input, shape index: {}]   ;;  %s2995_s3 = inlined_call_operand.vmem [shape: f32[16,256], index: 3, kind: input, shape index: {}]   ;;  %s2996_s4 = inlined_call_operand.vmem [shape: f32[16,16], index: 4, kind: input, shape index: {}]   ;;  %s2997_s5 = inlined_call_operand.vmem [shape: f32[16,16], index: 5, kind: input, shape index: {}]   ;;  %s2998_s6 = inlined_call_operand.vmem [shape: f32[16,1], index: 6, kind: input, shape index: {}]   ;;  %s2999_s7 = inlined_call_operand.vmem [shape: f32[8,16], index: 7, kind: input, shape index: {}]   ;;  %s3000_s8 = inlined_call_operand.vmem [shape: f32[8,1], index: 8, kind: input, shape index: {}]   ;;  %s3001_s9 = inlined_call_operand.vmem [shape: f32[8,1], index: 9, kind: input, shape index: {}]   ;;  %s3002_s10 = inlined_call_operand.<no memory space> [shape: f32[1,1], index: 10, kind: input, shape index: {}]   ;;  %s3003_s11 = inlined_call_operand.hbm [shape: f32[2,1,512], index: 11, kind: output, shape index: {}]  }
   0x1   :  { %v16_v0 = vstv %s3002_s10 }
   0x2   :  { %17 = vst [vmem:[#allocation2] sm:$0x1] %v16_v0 }
   0x3   :  { %18 = vsyncpa [#allocation4], 0 }
   0x4   :  { %20 = vsyncpa [#allocation4 + $0x1], 0  ;;  %s2072_s19 = smov 0   ;;  %s2074_s20 = smov 0  }
   0x5   :  { %s2076_s21 = smov 0   ;;  %s2078_s22 = smov 0  }
   0x6 LB: > { %s2093_s10 = sadd.s32 4294967295, %s2005_s22   ;;  %s1660_s23 = sadd.s32 4294967294, %s2005_s22   ;;  %s2005_s22 = sphi %s2078_s22, %s3017_s22   ;;  %s2001_s21 = sphi %s2076_s21, %s3016_s21   ;;  %s1997_s20 = sphi %s2074_s20, %s3015_s20   ;;  %s1993_s19 = sphi %s2072_s19, %s3014_s19  }
   0x7   : > { %s2097_s24 = sadd.s32 1, %s2005_s22   ;;  %s274_s25 = sadd.s32 1, %s2001_s21 }
   0x8   : > { %s271_s26 = ssub.s32 %s2005_s22, %s2097_s24  ;;  %p284_p0 = scmp.ne.s32.totalorder %s2001_s21, %s1997_s20 }
   0x9   : > { %p272_p1 = scmp.eq.s32.totalorder %s271_s26, 0  ;;  %p285_p2 = scmp.eq.s32.totalorder %s2093_s10, 1 }
   0xa   : > { %p290_p3 = scmp.ne.s32.totalorder %s1997_s20, %s1993_s19  ;;  %p291_p4 = scmp.eq.s32.totalorder %s1660_s23, 1 }
   0xb   : > { %s2108_s27 = scalar_select %p272_p1, %s2001_s21, %s274_s25  }
   0xc   : > { %p2110_p5 = por %p285_p2, %p284_p0  ;;  %p2114_p6 = por %p291_p4, %p290_p3 }
   0xd   : > { %p1663_p7 = scmp.ge.s32.totalorder %s2005_s22, 1  ;;  %p350_p8 = scmp.lt.s32.totalorder %s2005_s22, 3 }
   0xf   : > { %p351_p9 = pnand %p1663_p7, %p350_p8 }
  0x10   : > { %p393_p10 = scmp.lt.s32.totalorder (!%p351_p9), %s2093_s10, 1  ;;  %s390_s16 = sand.u32 (!%p351_p9), 1, %s1997_s20  }
  0x11   : > { %354 = sbr.rel (%p351_p9) target bundleno = 634 (0x27a), region = 64  ;;  %s2944_s17 = sshll.u32 (!%p351_p9), %s390_s16, 2 }
  0x12   : > { %s392_s26 = scalar_lea.vmem (!%p351_p9), [#allocation3], %s2944_s17  ;;  %s1574_s13 = scalar_lea.sflag (!%p351_p9), [#allocation4], %s390_s16 }
  0x16   : > { %v403_v1 = vlaneseq  ;;  %s2122_s30 = scalar_select %p393_p10, %s2093_s10, 1  ;;  %v2007_v12 = vmov 1.0   ;;  %v828_v36 = vld [vmem:[%s2994_s2] sm:$0xff]  ;;  %v829_v41 = vld [vmem:[%s2994_s2 + $0x8] sm:$0xff]  ;;  %v2703_v49 = vld [vmem:[%s2995_s3 + $0x10] sm:$0xff] }
  0x17   : > { %v2641_v47 = vld [vmem:[%s2995_s3] sm:$0xff]  ;;  %v2648_v48 = vld [vmem:[%s2995_s3 + $0x8] sm:$0xff]  ;;  %v2710_v50 = vld [vmem:[%s2995_s3 + $0x18] sm:$0xff] }
  0x18   : > { %v2125_v2 = vshrl.u32 %v403_v1, 7  ;;  %s1665_s12 = sshll.u32 %s2122_s30, 2  ;;  %s1586_s30 = sshll.u32 %s392_s26, 4  ;;  %s1587_s30 = int_to_ptr.vmem [resolvable:$true] %s1586_s30 }
  0x19   : > { %s396_s15 = scalar_lea.vmem %s2992_s0, %s1665_s12  ;;  %s400_s18 = scalar_lea.vmem %s2993_s1, %s1665_s12 }
  0x1a   : > { %v2134_v3 = vadd.s32 120, %v2125_v2  ;;  %v2137_v4 = vadd.s32 112, %v2125_v2  ;;  %v401_v5 = vld [vmem:[%s396_s15] sm:$0xf]  ;;  %v2142_v7 = vadd.s32 104, %v2125_v2  ;;  %v2155_v11 = vadd.s32 96, %v2125_v2 }
  0x1b   : > { %v2139_v6 = vperm.slane %v401_v5, 0  ;;  %v2144_v8 = vperm.slane %v401_v5, 1  ;;  %v2146_v9 = vperm.slane %v401_v5, 2  ;;  %v2148_v10 = vperm.slane %v401_v5, 3  ;;  %v2332_v24 = vld [vmem:[%s400_s18] sm:$0xf] }
  0x1c   : > { %v2175_v13 = vadd.s32 88, %v2125_v2  ;;  %v2190_v14 = vadd.s32 80, %v2125_v2  ;;  %v2205_v15 = vadd.s32 72, %v2125_v2  ;;  %v2220_v16 = vadd.s32 64, %v2125_v2  ;;  %v1112_v5 = vld [vmem:[%s2997_s5] sm:$0xff]  ;;  %s1880_s18 = sshll.u32 %s2093_s10, 2 }
  0x1d   : > { %vm484_vm0 = vcmp.eq.s32.totalorder %v2134_v3, %v2139_v6  ;;  %vm480_vm1 = vcmp.eq.s32.totalorder %v2137_v4, %v2139_v6  ;;  %vm485_vm2 = vcmp.eq.s32.totalorder %v2134_v3, %v2144_v8  ;;  %vm486_vm3 = vcmp.eq.s32.totalorder %v2134_v3, %v2146_v9  ;;  %s1584_s25 = scalar_lea.hbm %s3003_s11, %s1880_s18  ;;  %s1963_s10 = scalar_lea.hbm %s3003_s11, 8 }
  0x1e   : > { %1667 = vmatpush.msk.msra.mxu0 %vm484_vm0, %v2007_v12  ;;  %vm487_vm4 = vcmp.eq.s32.totalorder %v2134_v3, %v2148_v10  ;;  %vm481_vm5 = vcmp.eq.s32.totalorder %v2137_v4, %v2144_v8  ;;  %1683 = vmatpush.msk.msra.mxu1 %vm485_vm2, %v2007_v12  ;;  %vm482_vm6 = vcmp.eq.s32.totalorder %v2137_v4, %v2146_v9  ;;  %v2235_v17 = vadd.s32 56, %v2125_v2  ;;  %s1588_s12 = sshll.u32 %s1584_s25, 4  ;;  %s1589_s12 = int_to_ptr.hbm [resolvable:$true] %s1588_s12 }
  0x1f   : > { %1699 = vmatpush.msk.msra.mxu2 %vm486_vm3, %v2007_v12  ;;  %vm483_vm7 = vcmp.eq.s32.totalorder %v2137_v4, %v2148_v10  ;;  %vm476_vm8 = vcmp.eq.s32.totalorder %v2142_v7, %v2139_v6  ;;  %1715 = vmatpush.msk.msra.mxu3 %vm487_vm4, %v2007_v12  ;;  %vm477_vm9 = vcmp.eq.s32.totalorder %v2142_v7, %v2144_v8  ;;  %v2250_v18 = vadd.s32 48, %v2125_v2  ;;  %s1957_s14 = sshra.s32 %s1589_s12, 4  ;;  %s1958_s14 = int_to_ptr.hbm [resolvable:$true] %s1957_s14 }
  0x20   : > { %1668 = vmatpush.msk.msra.mxu0 %vm480_vm1, %v2007_v12  ;;  %vm478_vm10 = vcmp.eq.s32.totalorder %v2142_v7, %v2146_v9  ;;  %1684 = vmatpush.msk.msra.mxu1 %vm481_vm5, %v2007_v12  ;;  %vm479_vm11 = vcmp.eq.s32.totalorder %v2142_v7, %v2148_v10  ;;  %vm472_vm12 = vcmp.eq.s32.totalorder %v2155_v11, %v2139_v6  ;;  %v2265_v19 = vadd.s32 40, %v2125_v2  ;;  %s1959_s15 = scalar_lea.hbm %s1958_s14, 4  ;;  %p1964_p0 = scmp.lt.s32.totalorder %s1958_s14, %s3003_s11 }
  0x21   : > { %1700 = vmatpush.msk.msra.mxu2 %vm482_vm6, %v2007_v12  ;;  %1716 = vmatpush.msk.msra.mxu3 %vm483_vm7, %v2007_v12  ;;  %vm473_vm13 = vcmp.eq.s32.totalorder %v2155_v11, %v2144_v8  ;;  %vm474_vm14 = vcmp.eq.s32.totalorder %v2155_v11, %v2146_v9  ;;  %vm475_vm15 = vcmp.eq.s32.totalorder %v2155_v11, %v2148_v10  ;;  %v2280_v20 = vadd.s32 32, %v2125_v2  ;;  %p1960_p11 = scmp.ne.s32.totalorder %s1958_s14, %s1959_s15  ;;  %p1965_p1 = scmp.lt.s32.totalorder %s1963_s10, %s1959_s15 }
  0x22   : > { %1669 = vmatpush.msk.msra.mxu0 %vm476_vm8, %v2007_v12  ;;  %1685 = vmatpush.msk.msra.mxu1 %vm477_vm9, %v2007_v12  ;;  %vm468_vm0 = vcmp.eq.s32.totalorder %v2175_v13, %v2139_v6  ;;  %vm469_vm1 = vcmp.eq.s32.totalorder %v2175_v13, %v2144_v8  ;;  %vm470_vm2 = vcmp.eq.s32.totalorder %v2175_v13, %v2146_v9  ;;  %v2295_v21 = vadd.s32 24, %v2125_v2 }
  0x23   : > { %1701 = vmatpush.msk.msra.mxu2 %vm478_vm10, %v2007_v12  ;;  %1717 = vmatpush.msk.msra.mxu3 %vm479_vm11, %v2007_v12  ;;  %vm471_vm3 = vcmp.eq.s32.totalorder %v2175_v13, %v2148_v10  ;;  %vm464_vm4 = vcmp.eq.s32.totalorder %v2190_v14, %v2139_v6  ;;  %vm465_vm5 = vcmp.eq.s32.totalorder %v2190_v14, %v2144_v8  ;;  %v2315_v22 = vadd.s32 16, %v2125_v2  ;;  %p1961_p12 = pnand %p1960_p11, %p2110_p5  ;;  %p1966_p2 = por %p1965_p1, %p1964_p0 }
  0x24   : > { %1670 = vmatpush.msk.msra.mxu0 %vm472_vm12, %v2007_v12  ;;  %1686 = vmatpush.msk.msra.mxu1 %vm473_vm13, %v2007_v12  ;;  %vm466_vm6 = vcmp.eq.s32.totalorder %v2190_v14, %v2146_v9  ;;  %vm467_vm7 = vcmp.eq.s32.totalorder %v2190_v14, %v2148_v10  ;;  %vm460_vm8 = vcmp.eq.s32.totalorder %v2205_v15, %v2139_v6  ;;  %v2330_v23 = vadd.s32 8, %v2125_v2 }
  0x25   : > { %1702 = vmatpush.msk.msra.mxu2 %vm474_vm14, %v2007_v12  ;;  %1718 = vmatpush.msk.msra.mxu3 %vm475_vm15, %v2007_v12  ;;  %vm461_vm9 = vcmp.eq.s32.totalorder %v2205_v15, %v2144_v8  ;;  %vm462_vm10 = vcmp.eq.s32.totalorder %v2205_v15, %v2146_v9  ;;  %vm463_vm11 = vcmp.eq.s32.totalorder %v2205_v15, %v2148_v10  ;;  %v2353_v25 = vperm.slane %v2332_v24, 0  ;;  %p1962_p13 = pneg %p1961_p12 }
  0x26   : > { %1671 = vmatpush.msk.msra.mxu0 %vm468_vm0, %v2007_v12  ;;  %1687 = vmatpush.msk.msra.mxu1 %vm469_vm1, %v2007_v12  ;;  %vm456_vm12 = vcmp.eq.s32.totalorder %v2220_v16, %v2139_v6  ;;  %vm457_vm13 = vcmp.eq.s32.totalorder %v2220_v16, %v2144_v8  ;;  %vm458_vm14 = vcmp.eq.s32.totalorder %v2220_v16, %v2146_v9  ;;  %v2362_v26 = vperm.slane %v2332_v24, 1 }
  0x27   : > { %1703 = vmatpush.msk.msra.mxu2 %vm470_vm2, %v2007_v12  ;;  %1719 = vmatpush.msk.msra.mxu3 %vm471_vm3, %v2007_v12  ;;  %vm459_vm15 = vcmp.eq.s32.totalorder %v2220_v16, %v2148_v10  ;;  %vm452_vm0 = vcmp.eq.s32.totalorder %v2235_v17, %v2139_v6  ;;  %vm453_vm1 = vcmp.eq.s32.totalorder %v2235_v17, %v2144_v8  ;;  %v2371_v27 = vadd.s32 248, %v2125_v2  ;;  %p1967_p3 = pnand %p1966_p2, %p1962_p13 }
  0x28   : > { %1672 = vmatpush.msk.msra.mxu0 %vm464_vm4, %v2007_v12  ;;  %1688 = vmatpush.msk.msra.mxu1 %vm465_vm5, %v2007_v12  ;;  %vm454_vm2 = vcmp.eq.s32.totalorder %v2235_v17, %v2146_v9  ;;  %vm455_vm3 = vcmp.eq.s32.totalorder %v2235_v17, %v2148_v10  ;;  %vm448_vm4 = vcmp.eq.s32.totalorder %v2250_v18, %v2139_v6  ;;  %v2386_v28 = vadd.s32 240, %v2125_v2 }
  0x29   : > { %1704 = vmatpush.msk.msra.mxu2 %vm466_vm6, %v2007_v12  ;;  %1720 = vmatpush.msk.msra.mxu3 %vm467_vm7, %v2007_v12  ;;  %vm449_vm5 = vcmp.eq.s32.totalorder %v2250_v18, %v2144_v8  ;;  %vm450_vm6 = vcmp.eq.s32.totalorder %v2250_v18, %v2146_v9  ;;  %vm451_vm7 = vcmp.eq.s32.totalorder %v2250_v18, %v2148_v10  ;;  %v2401_v29 = vadd.s32 232, %v2125_v2 }
  0x2a   : > { %1673 = vmatpush.msk.msra.mxu0 %vm460_vm8, %v2007_v12  ;;  %1689 = vmatpush.msk.msra.mxu1 %vm461_vm9, %v2007_v12  ;;  %vm444_vm8 = vcmp.eq.s32.totalorder %v2265_v19, %v2139_v6  ;;  %vm445_vm9 = vcmp.eq.s32.totalorder %v2265_v19, %v2144_v8  ;;  %v2416_v30 = vadd.s32 224, %v2125_v2  ;;  %v2431_v31 = vadd.s32 216, %v2125_v2 }
  0x2b   : > { %1705 = vmatpush.msk.msra.mxu2 %vm462_vm10, %v2007_v12  ;;  %1721 = vmatpush.msk.msra.mxu3 %vm463_vm11, %v2007_v12  ;;  %vm446_vm10 = vcmp.eq.s32.totalorder %v2265_v19, %v2146_v9  ;;  %vm447_vm11 = vcmp.eq.s32.totalorder %v2265_v19, %v2148_v10  ;;  %v2446_v32 = vadd.s32 208, %v2125_v2  ;;  %v2461_v33 = vadd.s32 200, %v2125_v2 }
  0x2c   : > { %1674 = vmatpush.msk.msra.mxu0 %vm456_vm12, %v2007_v12  ;;  %1690 = vmatpush.msk.msra.mxu1 %vm457_vm13, %v2007_v12  ;;  %vm440_vm12 = vcmp.eq.s32.totalorder %v2280_v20, %v2139_v6  ;;  %vm441_vm13 = vcmp.eq.s32.totalorder %v2280_v20, %v2144_v8  ;;  %v2476_v34 = vadd.s32 192, %v2125_v2  ;;  %v2503_v35 = vadd.s32 184, %v2125_v2 }
  0x2d   : > { %1706 = vmatpush.msk.msra.mxu2 %vm458_vm14, %v2007_v12  ;;  %1722 = vmatpush.msk.msra.mxu3 %vm459_vm15, %v2007_v12  ;;  %vm442_vm14 = vcmp.eq.s32.totalorder %v2280_v20, %v2146_v9  ;;  %vm443_vm15 = vcmp.eq.s32.totalorder %v2280_v20, %v2148_v10  ;;  %v2515_v37 = vadd.s32 176, %v2125_v2  ;;  %v2527_v38 = vadd.s32 168, %v2125_v2 }
  0x2e   : > { %1675 = vmatpush.msk.msra.mxu0 %vm452_vm0, %v2007_v12  ;;  %1691 = vmatpush.msk.msra.mxu1 %vm453_vm1, %v2007_v12  ;;  %vm436_vm0 = vcmp.eq.s32.totalorder %v2295_v21, %v2139_v6  ;;  %vm437_vm1 = vcmp.eq.s32.totalorder %v2295_v21, %v2144_v8  ;;  %v2539_v39 = vadd.s32 160, %v2125_v2  ;;  %v2566_v40 = vadd.s32 152, %v2125_v2 }
  0x2f   : > { %1707 = vmatpush.msk.msra.mxu2 %vm454_vm2, %v2007_v12  ;;  %1723 = vmatpush.msk.msra.mxu3 %vm455_vm3, %v2007_v12  ;;  %vm438_vm2 = vcmp.eq.s32.totalorder %v2295_v21, %v2146_v9  ;;  %vm439_vm3 = vcmp.eq.s32.totalorder %v2295_v21, %v2148_v10  ;;  %v2578_v42 = vadd.s32 144, %v2125_v2  ;;  %v2590_v43 = vadd.s32 136, %v2125_v2 }
  0x30   : > { %1676 = vmatpush.msk.msra.mxu0 %vm448_vm4, %v2007_v12  ;;  %1692 = vmatpush.msk.msra.mxu1 %vm449_vm5, %v2007_v12  ;;  %vm432_vm4 = vcmp.eq.s32.totalorder %v2315_v22, %v2139_v6  ;;  %vm433_vm5 = vcmp.eq.s32.totalorder %v2315_v22, %v2144_v8  ;;  %v2602_v44 = vadd.s32 128, %v2125_v2  ;;  %v2617_v45 = vperm.slane %v2332_v24, 2 }
  0x31   : > { %1708 = vmatpush.msk.msra.mxu2 %vm450_vm6, %v2007_v12  ;;  %1724 = vmatpush.msk.msra.mxu3 %vm451_vm7, %v2007_v12  ;;  %vm434_vm6 = vcmp.eq.s32.totalorder %v2315_v22, %v2146_v9  ;;  %vm435_vm7 = vcmp.eq.s32.totalorder %v2315_v22, %v2148_v10  ;;  %v2626_v46 = vperm.slane %v2332_v24, 3 }
  0x32   : > { %1677 = vmatpush.msk.msra.mxu0 %vm444_vm8, %v2007_v12  ;;  %1693 = vmatpush.msk.msra.mxu1 %vm445_vm9, %v2007_v12  ;;  %vm428_vm8 = vcmp.eq.s32.totalorder %v2330_v23, %v2139_v6  ;;  %vm429_vm9 = vcmp.eq.s32.totalorder %v2330_v23, %v2144_v8 }
  0x33   : > { %1709 = vmatpush.msk.msra.mxu2 %vm446_vm10, %v2007_v12  ;;  %1725 = vmatpush.msk.msra.mxu3 %vm447_vm11, %v2007_v12  ;;  %vm430_vm10 = vcmp.eq.s32.totalorder %v2330_v23, %v2146_v9  ;;  %vm431_vm11 = vcmp.eq.s32.totalorder %v2330_v23, %v2148_v10 }
  0x34   : > { %1678 = vmatpush.msk.msra.mxu0 %vm440_vm12, %v2007_v12  ;;  %1694 = vmatpush.msk.msra.mxu1 %vm441_vm13, %v2007_v12  ;;  %vm424_vm12 = vcmp.eq.s32.totalorder %v2125_v2, %v2139_v6  ;;  %vm425_vm13 = vcmp.eq.s32.totalorder %v2125_v2, %v2144_v8 }
  0x35   : > { %1710 = vmatpush.msk.msra.mxu2 %vm442_vm14, %v2007_v12  ;;  %1726 = vmatpush.msk.msra.mxu3 %vm443_vm15, %v2007_v12  ;;  %vm426_vm14 = vcmp.eq.s32.totalorder %v2125_v2, %v2146_v9  ;;  %vm427_vm15 = vcmp.eq.s32.totalorder %v2125_v2, %v2148_v10  ;;  %v1113_v9 = vld [vmem:[%s2997_s5 + $0x8] sm:$0xff]  ;;  %v1110_v10 = vld [vmem:[%s2996_s4] sm:$0xff] }
  0x36   : > { %1679 = vmatpush.msk.msra.mxu0 %vm436_vm0, %v2007_v12  ;;  %1695 = vmatpush.msk.msra.mxu1 %vm437_vm1, %v2007_v12  ;;  %vm632_vm0 = vcmp.eq.s32.totalorder %v2134_v3, %v2353_v25  ;;  %vm696_vm1 = vcmp.eq.s32.totalorder %v2371_v27, %v2353_v25 }
  0x37   : > { %1711 = vmatpush.msk.msra.mxu2 %vm438_vm2, %v2007_v12  ;;  %1727 = vmatpush.msk.msra.mxu3 %vm439_vm3, %v2007_v12  ;;  %vm633_vm2 = vcmp.eq.s32.totalorder %v2134_v3, %v2362_v26  ;;  %vm697_vm3 = vcmp.eq.s32.totalorder %v2371_v27, %v2362_v26 }
  0x38   : > { %1680 = vmatpush.msk.msra.mxu0 %vm432_vm4, %v2007_v12  ;;  %1696 = vmatpush.msk.msra.mxu1 %vm433_vm5, %v2007_v12  ;;  %vm628_vm4 = vcmp.eq.s32.totalorder %v2137_v4, %v2353_v25  ;;  %vm692_vm5 = vcmp.eq.s32.totalorder %v2386_v28, %v2353_v25 }
  0x39   : > { %1712 = vmatpush.msk.msra.mxu2 %vm434_vm6, %v2007_v12  ;;  %1728 = vmatpush.msk.msra.mxu3 %vm435_vm7, %v2007_v12  ;;  %vm629_vm6 = vcmp.eq.s32.totalorder %v2137_v4, %v2362_v26  ;;  %vm693_vm7 = vcmp.eq.s32.totalorder %v2386_v28, %v2362_v26 }
  0x3a   : > { %1681 = vmatpush.msk.msra.mxu0 %vm428_vm8, %v2007_v12  ;;  %1697 = vmatpush.msk.msra.mxu1 %vm429_vm9, %v2007_v12  ;;  %vm624_vm8 = vcmp.eq.s32.totalorder %v2142_v7, %v2353_v25  ;;  %vm688_vm9 = vcmp.eq.s32.totalorder %v2401_v29, %v2353_v25 }
  0x3b   : > { %1713 = vmatpush.msk.msra.mxu2 %vm430_vm10, %v2007_v12  ;;  %1729 = vmatpush.msk.msra.mxu3 %vm431_vm11, %v2007_v12  ;;  %vm625_vm10 = vcmp.eq.s32.totalorder %v2142_v7, %v2362_v26  ;;  %vm689_vm11 = vcmp.eq.s32.totalorder %v2401_v29, %v2362_v26 }
  0x3c   : > { %1682 = vmatpush.msk.msra.mxu0 %vm424_vm12, %v2007_v12  ;;  %1698 = vmatpush.msk.msra.mxu1 %vm425_vm13, %v2007_v12  ;;  %vm620_vm12 = vcmp.eq.s32.totalorder %v2155_v11, %v2353_v25  ;;  %vm684_vm13 = vcmp.eq.s32.totalorder %v2416_v30, %v2353_v25 }
  0x3d   : > { %1714 = vmatpush.msk.msra.mxu2 %vm426_vm14, %v2007_v12  ;;  %1730 = vmatpush.msk.msra.mxu3 %vm427_vm15, %v2007_v12  ;;  %vm621_vm14 = vcmp.eq.s32.totalorder %v2155_v11, %v2362_v26  ;;  %vm685_vm15 = vcmp.eq.s32.totalorder %v2416_v30, %v2362_v26 }
  0x3e   : > { %1731 = vmatpush.msk.msrb.mxu0 %vm632_vm0, %v2007_v12  ;;  %1747 = vmatpush.msk.msrb.mxu1 %vm696_vm1, %v2007_v12  ;;  %vm616_vm0 = vcmp.eq.s32.totalorder %v2175_v13, %v2353_v25  ;;  %vm680_vm1 = vcmp.eq.s32.totalorder %v2431_v31, %v2353_v25 }
  0x3f   : > { %1763 = vmatpush.msk.msrb.mxu2 %vm633_vm2, %v2007_v12  ;;  %1779 = vmatpush.msk.msrb.mxu3 %vm697_vm3, %v2007_v12  ;;  %vm617_vm2 = vcmp.eq.s32.totalorder %v2175_v13, %v2362_v26  ;;  %vm681_vm3 = vcmp.eq.s32.totalorder %v2431_v31, %v2362_v26 }
  0x40   : > { %1732 = vmatpush.msk.msrb.mxu0 %vm628_vm4, %v2007_v12  ;;  %1748 = vmatpush.msk.msrb.mxu1 %vm692_vm5, %v2007_v12  ;;  %vm612_vm4 = vcmp.eq.s32.totalorder %v2190_v14, %v2353_v25  ;;  %vm676_vm5 = vcmp.eq.s32.totalorder %v2446_v32, %v2353_v25 }
  0x41   : > { %1764 = vmatpush.msk.msrb.mxu2 %vm629_vm6, %v2007_v12  ;;  %1780 = vmatpush.msk.msrb.mxu3 %vm693_vm7, %v2007_v12  ;;  %vm613_vm6 = vcmp.eq.s32.totalorder %v2190_v14, %v2362_v26  ;;  %vm677_vm7 = vcmp.eq.s32.totalorder %v2446_v32, %v2362_v26 }
  0x42   : > { %1733 = vmatpush.msk.msrb.mxu0 %vm624_vm8, %v2007_v12  ;;  %1749 = vmatpush.msk.msrb.mxu1 %vm688_vm9, %v2007_v12  ;;  %vm608_vm8 = vcmp.eq.s32.totalorder %v2205_v15, %v2353_v25  ;;  %vm672_vm9 = vcmp.eq.s32.totalorder %v2461_v33, %v2353_v25 }
  0x43   : > { %1765 = vmatpush.msk.msrb.mxu2 %vm625_vm10, %v2007_v12  ;;  %1781 = vmatpush.msk.msrb.mxu3 %vm689_vm11, %v2007_v12  ;;  %vm609_vm10 = vcmp.eq.s32.totalorder %v2205_v15, %v2362_v26  ;;  %vm673_vm11 = vcmp.eq.s32.totalorder %v2461_v33, %v2362_v26 }
  0x44   : > { %1734 = vmatpush.msk.msrb.mxu0 %vm620_vm12, %v2007_v12  ;;  %1750 = vmatpush.msk.msrb.mxu1 %vm684_vm13, %v2007_v12  ;;  %vm604_vm12 = vcmp.eq.s32.totalorder %v2220_v16, %v2353_v25  ;;  %vm668_vm13 = vcmp.eq.s32.totalorder %v2476_v34, %v2353_v25 }
  0x45   : > { %1766 = vmatpush.msk.msrb.mxu2 %vm621_vm14, %v2007_v12  ;;  %1782 = vmatpush.msk.msrb.mxu3 %vm685_vm15, %v2007_v12  ;;  %vm605_vm14 = vcmp.eq.s32.totalorder %v2220_v16, %v2362_v26  ;;  %vm669_vm15 = vcmp.eq.s32.totalorder %v2476_v34, %v2362_v26 }
  0x46   : > { %1735 = vmatpush.msk.msrb.mxu0 %vm616_vm0, %v2007_v12  ;;  %1751 = vmatpush.msk.msrb.mxu1 %vm680_vm1, %v2007_v12  ;;  %vm600_vm0 = vcmp.eq.s32.totalorder %v2235_v17, %v2353_v25  ;;  %vm664_vm1 = vcmp.eq.s32.totalorder %v2503_v35, %v2353_v25 }
  0x47   : > { %1767 = vmatpush.msk.msrb.mxu2 %vm617_vm2, %v2007_v12  ;;  %1783 = vmatpush.msk.msrb.mxu3 %vm681_vm3, %v2007_v12  ;;  %vm601_vm2 = vcmp.eq.s32.totalorder %v2235_v17, %v2362_v26  ;;  %vm665_vm3 = vcmp.eq.s32.totalorder %v2503_v35, %v2362_v26 }
  0x48   : > { %1736 = vmatpush.msk.msrb.mxu0 %vm612_vm4, %v2007_v12  ;;  %1752 = vmatpush.msk.msrb.mxu1 %vm676_vm5, %v2007_v12  ;;  %vm596_vm4 = vcmp.eq.s32.totalorder %v2250_v18, %v2353_v25  ;;  %vm660_vm5 = vcmp.eq.s32.totalorder %v2515_v37, %v2353_v25 }
  0x49   : > { %1768 = vmatpush.msk.msrb.mxu2 %vm613_vm6, %v2007_v12  ;;  %1784 = vmatpush.msk.msrb.mxu3 %vm677_vm7, %v2007_v12  ;;  %vm597_vm6 = vcmp.eq.s32.totalorder %v2250_v18, %v2362_v26  ;;  %vm661_vm7 = vcmp.eq.s32.totalorder %v2515_v37, %v2362_v26 }
  0x4a   : > { %1737 = vmatpush.msk.msrb.mxu0 %vm608_vm8, %v2007_v12  ;;  %1753 = vmatpush.msk.msrb.mxu1 %vm672_vm9, %v2007_v12  ;;  %vm592_vm8 = vcmp.eq.s32.totalorder %v2265_v19, %v2353_v25  ;;  %vm656_vm9 = vcmp.eq.s32.totalorder %v2527_v38, %v2353_v25 }
  0x4b   : > { %1769 = vmatpush.msk.msrb.mxu2 %vm609_vm10, %v2007_v12  ;;  %1785 = vmatpush.msk.msrb.mxu3 %vm673_vm11, %v2007_v12  ;;  %vm593_vm10 = vcmp.eq.s32.totalorder %v2265_v19, %v2362_v26  ;;  %vm657_vm11 = vcmp.eq.s32.totalorder %v2527_v38, %v2362_v26 }
  0x4c   : > { %1738 = vmatpush.msk.msrb.mxu0 %vm604_vm12, %v2007_v12  ;;  %1754 = vmatpush.msk.msrb.mxu1 %vm668_vm13, %v2007_v12  ;;  %vm588_vm12 = vcmp.eq.s32.totalorder %v2280_v20, %v2353_v25  ;;  %vm652_vm13 = vcmp.eq.s32.totalorder %v2539_v39, %v2353_v25 }
  0x4d   : > { %1770 = vmatpush.msk.msrb.mxu2 %vm605_vm14, %v2007_v12  ;;  %1786 = vmatpush.msk.msrb.mxu3 %vm669_vm15, %v2007_v12  ;;  %vm589_vm14 = vcmp.eq.s32.totalorder %v2280_v20, %v2362_v26  ;;  %vm653_vm15 = vcmp.eq.s32.totalorder %v2539_v39, %v2362_v26 }
  0x4e   : > { %846 = vmatmul.f32.vlgmr.msra.gmra.mxu0 %v828_v36  ;;  %869 = vmatmul.f32.vlgmr.msra.gmra.mxu1 %v828_v36 }
  0x4f   : > { %892 = vmatmul.f32.vlgmr.msra.gmra.mxu2 %v828_v36  ;;  %915 = vmatmul.f32.vlgmr.msra.gmra.mxu3 %v828_v36 }
  0x50   : > { %1739 = vmatpush.msk.msrb.mxu0 %vm600_vm0, %v2007_v12  ;;  %1755 = vmatpush.msk.msrb.mxu1 %vm664_vm1, %v2007_v12  ;;  %vm584_vm0 = vcmp.eq.s32.totalorder %v2295_v21, %v2353_v25  ;;  %vm648_vm1 = vcmp.eq.s32.totalorder %v2566_v40, %v2353_v25 }
  0x51   : > { %1771 = vmatpush.msk.msrb.mxu2 %vm601_vm2, %v2007_v12  ;;  %1787 = vmatpush.msk.msrb.mxu3 %vm665_vm3, %v2007_v12  ;;  %vm585_vm2 = vcmp.eq.s32.totalorder %v2295_v21, %v2362_v26  ;;  %vm649_vm3 = vcmp.eq.s32.totalorder %v2566_v40, %v2362_v26 }
  0x52   : > { %1740 = vmatpush.msk.msrb.mxu0 %vm596_vm4, %v2007_v12  ;;  %1756 = vmatpush.msk.msrb.mxu1 %vm660_vm5, %v2007_v12  ;;  %vm580_vm4 = vcmp.eq.s32.totalorder %v2315_v22, %v2353_v25  ;;  %vm644_vm5 = vcmp.eq.s32.totalorder %v2578_v42, %v2353_v25 }
  0x53   : > { %1772 = vmatpush.msk.msrb.mxu2 %vm597_vm6, %v2007_v12  ;;  %1788 = vmatpush.msk.msrb.mxu3 %vm661_vm7, %v2007_v12  ;;  %vm581_vm6 = vcmp.eq.s32.totalorder %v2315_v22, %v2362_v26  ;;  %vm645_vm7 = vcmp.eq.s32.totalorder %v2578_v42, %v2362_v26 }
  0x54   : > { %1741 = vmatpush.msk.msrb.mxu0 %vm592_vm8, %v2007_v12  ;;  %1757 = vmatpush.msk.msrb.mxu1 %vm656_vm9, %v2007_v12  ;;  %vm576_vm8 = vcmp.eq.s32.totalorder %v2330_v23, %v2353_v25  ;;  %vm640_vm9 = vcmp.eq.s32.totalorder %v2590_v43, %v2353_v25 }
  0x55   : > { %1773 = vmatpush.msk.msrb.mxu2 %vm593_vm10, %v2007_v12  ;;  %1789 = vmatpush.msk.msrb.mxu3 %vm657_vm11, %v2007_v12  ;;  %vm577_vm10 = vcmp.eq.s32.totalorder %v2330_v23, %v2362_v26  ;;  %vm641_vm11 = vcmp.eq.s32.totalorder %v2590_v43, %v2362_v26 }
  0x56   : > { %1742 = vmatpush.msk.msrb.mxu0 %vm588_vm12, %v2007_v12  ;;  %1758 = vmatpush.msk.msrb.mxu1 %vm652_vm13, %v2007_v12  ;;  %vm572_vm12 = vcmp.eq.s32.totalorder %v2125_v2, %v2353_v25  ;;  %vm636_vm13 = vcmp.eq.s32.totalorder %v2602_v44, %v2353_v25 }
  0x57   : > { %1774 = vmatpush.msk.msrb.mxu2 %vm589_vm14, %v2007_v12  ;;  %1790 = vmatpush.msk.msrb.mxu3 %vm653_vm15, %v2007_v12  ;;  %vm573_vm14 = vcmp.eq.s32.totalorder %v2125_v2, %v2362_v26  ;;  %vm637_vm15 = vcmp.eq.s32.totalorder %v2602_v44, %v2362_v26 }
  0x58   : > { %849 = vmatmul.f32.gmra.mxu0 %v829_v41  ;;  %872 = vmatmul.f32.gmra.mxu1 %v829_v41 }
  0x59   : > { %895 = vmatmul.f32.gmra.mxu2 %v829_v41  ;;  %918 = vmatmul.f32.gmra.mxu3 %v829_v41 }
  0x5a   : > { %1743 = vmatpush.msk.msrb.mxu0 %vm584_vm0, %v2007_v12  ;;  %1759 = vmatpush.msk.msrb.mxu1 %vm648_vm1, %v2007_v12  ;;  %vm634_vm0 = vcmp.eq.s32.totalorder %v2134_v3, %v2617_v45  ;;  %vm698_vm1 = vcmp.eq.s32.totalorder %v2371_v27, %v2617_v45 }
  0x5b   : > { %1775 = vmatpush.msk.msrb.mxu2 %vm585_vm2, %v2007_v12  ;;  %1791 = vmatpush.msk.msrb.mxu3 %vm649_vm3, %v2007_v12  ;;  %vm635_vm2 = vcmp.eq.s32.totalorder %v2134_v3, %v2626_v46  ;;  %vm699_vm3 = vcmp.eq.s32.totalorder %v2371_v27, %v2626_v46 }
  0x5c   : > { %1744 = vmatpush.msk.msrb.mxu0 %vm580_vm4, %v2007_v12  ;;  %1760 = vmatpush.msk.msrb.mxu1 %vm644_vm5, %v2007_v12  ;;  %vm630_vm4 = vcmp.eq.s32.totalorder %v2137_v4, %v2617_v45  ;;  %vm694_vm5 = vcmp.eq.s32.totalorder %v2386_v28, %v2617_v45 }
  0x5d   : > { %1776 = vmatpush.msk.msrb.mxu2 %vm581_vm6, %v2007_v12  ;;  %1792 = vmatpush.msk.msrb.mxu3 %vm645_vm7, %v2007_v12  ;;  %vm631_vm6 = vcmp.eq.s32.totalorder %v2137_v4, %v2626_v46  ;;  %vm695_vm7 = vcmp.eq.s32.totalorder %v2386_v28, %v2626_v46 }
  0x5e   : > { %1745 = vmatpush.msk.msrb.mxu0 %vm576_vm8, %v2007_v12  ;;  %1761 = vmatpush.msk.msrb.mxu1 %vm640_vm9, %v2007_v12  ;;  %vm626_vm8 = vcmp.eq.s32.totalorder %v2142_v7, %v2617_v45  ;;  %vm690_vm9 = vcmp.eq.s32.totalorder %v2401_v29, %v2617_v45 }
  0x5f   : > { %1777 = vmatpush.msk.msrb.mxu2 %vm577_vm10, %v2007_v12  ;;  %1793 = vmatpush.msk.msrb.mxu3 %vm641_vm11, %v2007_v12  ;;  %vm627_vm10 = vcmp.eq.s32.totalorder %v2142_v7, %v2626_v46  ;;  %vm691_vm11 = vcmp.eq.s32.totalorder %v2401_v29, %v2626_v46 }
  0x60   : > { %1746 = vmatpush.msk.msrb.mxu0 %vm572_vm12, %v2007_v12  ;;  %1762 = vmatpush.msk.msrb.mxu1 %vm636_vm13, %v2007_v12  ;;  %vm622_vm12 = vcmp.eq.s32.totalorder %v2155_v11, %v2617_v45  ;;  %vm686_vm13 = vcmp.eq.s32.totalorder %v2416_v30, %v2617_v45 }
  0x61   : > { %1778 = vmatpush.msk.msrb.mxu2 %vm573_vm14, %v2007_v12  ;;  %1794 = vmatpush.msk.msrb.mxu3 %vm637_vm15, %v2007_v12  ;;  %vm623_vm14 = vcmp.eq.s32.totalorder %v2155_v11, %v2626_v46  ;;  %vm687_vm15 = vcmp.eq.s32.totalorder %v2416_v30, %v2626_v46 }
  0x62   : > { %942 = vmatmul.f32.vlgmr.msrb.gmra.mxu0 %v2641_v47  ;;  %965 = vmatmul.f32.vlgmr.msrb.gmra.mxu1 %v2648_v48 }
  0x63   : > { %988 = vmatmul.f32.vlgmr.msrb.gmra.mxu2 %v2641_v47  ;;  %1011 = vmatmul.f32.vlgmr.msrb.gmra.mxu3 %v2648_v48 }
  0x64   : > { %1795 = vmatpush.msk.msra.mxu0 %vm634_vm0, %v2007_v12  ;;  %1811 = vmatpush.msk.msra.mxu1 %vm698_vm1, %v2007_v12  ;;  %vm618_vm0 = vcmp.eq.s32.totalorder %v2175_v13, %v2617_v45  ;;  %vm682_vm1 = vcmp.eq.s32.totalorder %v2431_v31, %v2617_v45 }
  0x65   : > { %1827 = vmatpush.msk.msra.mxu2 %vm635_vm2, %v2007_v12  ;;  %1843 = vmatpush.msk.msra.mxu3 %vm699_vm3, %v2007_v12  ;;  %vm619_vm2 = vcmp.eq.s32.totalorder %v2175_v13, %v2626_v46  ;;  %vm683_vm3 = vcmp.eq.s32.totalorder %v2431_v31, %v2626_v46 }
  0x66   : > { %1796 = vmatpush.msk.msra.mxu0 %vm630_vm4, %v2007_v12  ;;  %1812 = vmatpush.msk.msra.mxu1 %vm694_vm5, %v2007_v12  ;;  %vm614_vm4 = vcmp.eq.s32.totalorder %v2190_v14, %v2617_v45  ;;  %vm678_vm5 = vcmp.eq.s32.totalorder %v2446_v32, %v2617_v45 }
  0x67   : > { %1828 = vmatpush.msk.msra.mxu2 %vm631_vm6, %v2007_v12  ;;  %1844 = vmatpush.msk.msra.mxu3 %vm695_vm7, %v2007_v12  ;;  %vm615_vm6 = vcmp.eq.s32.totalorder %v2190_v14, %v2626_v46  ;;  %vm679_vm7 = vcmp.eq.s32.totalorder %v2446_v32, %v2626_v46  ;;  %v1312_v14 = vld [vmem:[%s2998_s6 + $0x8] sm:$0xff] }
  0x68   : > { %1797 = vmatpush.msk.msra.mxu0 %vm626_vm8, %v2007_v12  ;;  %1813 = vmatpush.msk.msra.mxu1 %vm690_vm9, %v2007_v12  ;;  %vm610_vm8 = vcmp.eq.s32.totalorder %v2205_v15, %v2617_v45  ;;  %vm674_vm9 = vcmp.eq.s32.totalorder %v2461_v33, %v2617_v45 }
  0x69   : > { %1829 = vmatpush.msk.msra.mxu2 %vm627_vm10, %v2007_v12  ;;  %1845 = vmatpush.msk.msra.mxu3 %vm691_vm11, %v2007_v12  ;;  %vm611_vm10 = vcmp.eq.s32.totalorder %v2205_v15, %v2626_v46  ;;  %vm675_vm11 = vcmp.eq.s32.totalorder %v2461_v33, %v2626_v46  ;;  %v1111_v15 = vld [vmem:[%s2996_s4 + $0x8] sm:$0xff] }
  0x6a   : > { %1798 = vmatpush.msk.msra.mxu0 %vm622_vm12, %v2007_v12  ;;  %1814 = vmatpush.msk.msra.mxu1 %vm686_vm13, %v2007_v12  ;;  %vm606_vm12 = vcmp.eq.s32.totalorder %v2220_v16, %v2617_v45  ;;  %vm670_vm13 = vcmp.eq.s32.totalorder %v2476_v34, %v2617_v45 }
  0x6b   : > { %1830 = vmatpush.msk.msra.mxu2 %vm623_vm14, %v2007_v12  ;;  %1846 = vmatpush.msk.msra.mxu3 %vm687_vm15, %v2007_v12  ;;  %vm607_vm14 = vcmp.eq.s32.totalorder %v2220_v16, %v2626_v46  ;;  %vm671_vm15 = vcmp.eq.s32.totalorder %v2476_v34, %v2626_v46 }
  0x6c   : > { %945 = vmatmul.f32.gmra.mxu0 %v2703_v49  ;;  %968 = vmatmul.f32.gmra.mxu1 %v2710_v50 }
  0x6d   : > { %991 = vmatmul.f32.gmra.mxu2 %v2703_v49  ;;  %1014 = vmatmul.f32.gmra.mxu3 %v2710_v50 }
  0x6e   : > { %1799 = vmatpush.msk.msra.mxu0 %vm618_vm0, %v2007_v12  ;;  %1815 = vmatpush.msk.msra.mxu1 %vm682_vm1, %v2007_v12  ;;  %vm602_vm0 = vcmp.eq.s32.totalorder %v2235_v17, %v2617_v45  ;;  %vm666_vm1 = vcmp.eq.s32.totalorder %v2503_v35, %v2617_v45 }
  0x6f   : > { %1831 = vmatpush.msk.msra.mxu2 %vm619_vm2, %v2007_v12  ;;  %1847 = vmatpush.msk.msra.mxu3 %vm683_vm3, %v2007_v12  ;;  %vm603_vm2 = vcmp.eq.s32.totalorder %v2235_v17, %v2626_v46  ;;  %vm667_vm3 = vcmp.eq.s32.totalorder %v2503_v35, %v2626_v46 }
  0x70   : > { %1800 = vmatpush.msk.msra.mxu0 %vm614_vm4, %v2007_v12  ;;  %1816 = vmatpush.msk.msra.mxu1 %vm678_vm5, %v2007_v12  ;;  %vm598_vm4 = vcmp.eq.s32.totalorder %v2250_v18, %v2617_v45  ;;  %vm662_vm5 = vcmp.eq.s32.totalorder %v2515_v37, %v2617_v45 }
  0x71   : > { %1832 = vmatpush.msk.msra.mxu2 %vm615_vm6, %v2007_v12  ;;  %1848 = vmatpush.msk.msra.mxu3 %vm679_vm7, %v2007_v12  ;;  %vm599_vm6 = vcmp.eq.s32.totalorder %v2250_v18, %v2626_v46  ;;  %vm663_vm7 = vcmp.eq.s32.totalorder %v2515_v37, %v2626_v46 }
  0x72   : > { %1801 = vmatpush.msk.msra.mxu0 %vm610_vm8, %v2007_v12  ;;  %1817 = vmatpush.msk.msra.mxu1 %vm674_vm9, %v2007_v12  ;;  %vm594_vm8 = vcmp.eq.s32.totalorder %v2265_v19, %v2617_v45  ;;  %vm658_vm9 = vcmp.eq.s32.totalorder %v2527_v38, %v2617_v45 }
  0x73   : > { %1833 = vmatpush.msk.msra.mxu2 %vm611_vm10, %v2007_v12  ;;  %1849 = vmatpush.msk.msra.mxu3 %vm675_vm11, %v2007_v12  ;;  %vm595_vm10 = vcmp.eq.s32.totalorder %v2265_v19, %v2626_v46  ;;  %vm659_vm11 = vcmp.eq.s32.totalorder %v2527_v38, %v2626_v46 }
  0x74   : > { %1802 = vmatpush.msk.msra.mxu0 %vm606_vm12, %v2007_v12  ;;  %1818 = vmatpush.msk.msra.mxu1 %vm670_vm13, %v2007_v12  ;;  %vm590_vm12 = vcmp.eq.s32.totalorder %v2280_v20, %v2617_v45  ;;  %vm654_vm13 = vcmp.eq.s32.totalorder %v2539_v39, %v2617_v45 }
  0x75   : > { %1834 = vmatpush.msk.msra.mxu2 %vm607_vm14, %v2007_v12  ;;  %1850 = vmatpush.msk.msra.mxu3 %vm671_vm15, %v2007_v12  ;;  %vm591_vm14 = vcmp.eq.s32.totalorder %v2280_v20, %v2626_v46  ;;  %vm655_vm15 = vcmp.eq.s32.totalorder %v2539_v39, %v2626_v46 }
  0x76   : > { %1803 = vmatpush.msk.msra.mxu0 %vm602_vm0, %v2007_v12  ;;  %1819 = vmatpush.msk.msra.mxu1 %vm666_vm1, %v2007_v12  ;;  %vm586_vm0 = vcmp.eq.s32.totalorder %v2295_v21, %v2617_v45  ;;  %vm650_vm1 = vcmp.eq.s32.totalorder %v2566_v40, %v2617_v45 }
  0x77   : > { %1835 = vmatpush.msk.msra.mxu2 %vm603_vm2, %v2007_v12  ;;  %1851 = vmatpush.msk.msra.mxu3 %vm667_vm3, %v2007_v12  ;;  %vm587_vm2 = vcmp.eq.s32.totalorder %v2295_v21, %v2626_v46  ;;  %vm651_vm3 = vcmp.eq.s32.totalorder %v2566_v40, %v2626_v46 }
  0x78   : > { %1804 = vmatpush.msk.msra.mxu0 %vm598_vm4, %v2007_v12  ;;  %1820 = vmatpush.msk.msra.mxu1 %vm662_vm5, %v2007_v12  ;;  %vm582_vm4 = vcmp.eq.s32.totalorder %v2315_v22, %v2617_v45  ;;  %vm646_vm5 = vcmp.eq.s32.totalorder %v2578_v42, %v2617_v45 }
  0x79   : > { %1836 = vmatpush.msk.msra.mxu2 %vm599_vm6, %v2007_v12  ;;  %1852 = vmatpush.msk.msra.mxu3 %vm663_vm7, %v2007_v12  ;;  %vm583_vm6 = vcmp.eq.s32.totalorder %v2315_v22, %v2626_v46  ;;  %vm647_vm7 = vcmp.eq.s32.totalorder %v2578_v42, %v2626_v46  ;;  %v1311_v22 = vld [vmem:[%s2998_s6] sm:$0xff] }
  0x7a   : > { %1805 = vmatpush.msk.msra.mxu0 %vm594_vm8, %v2007_v12  ;;  %1821 = vmatpush.msk.msra.mxu1 %vm658_vm9, %v2007_v12  ;;  %vm578_vm8 = vcmp.eq.s32.totalorder %v2330_v23, %v2617_v45  ;;  %vm642_vm9 = vcmp.eq.s32.totalorder %v2590_v43, %v2617_v45 }
  0x7b   : > { %1837 = vmatpush.msk.msra.mxu2 %vm595_vm10, %v2007_v12  ;;  %1853 = vmatpush.msk.msra.mxu3 %vm659_vm11, %v2007_v12  ;;  %vm579_vm10 = vcmp.eq.s32.totalorder %v2330_v23, %v2626_v46  ;;  %vm643_vm11 = vcmp.eq.s32.totalorder %v2590_v43, %v2626_v46 }
  0x7c   : > { %1806 = vmatpush.msk.msra.mxu0 %vm590_vm12, %v2007_v12  ;;  %1822 = vmatpush.msk.msra.mxu1 %vm654_vm13, %v2007_v12  ;;  %vm574_vm12 = vcmp.eq.s32.totalorder %v2125_v2, %v2617_v45  ;;  %vm638_vm13 = vcmp.eq.s32.totalorder %v2602_v44, %v2617_v45 }
  0x7d   : > { %1838 = vmatpush.msk.msra.mxu2 %vm591_vm14, %v2007_v12  ;;  %1854 = vmatpush.msk.msra.mxu3 %vm655_vm15, %v2007_v12  ;;  %vm575_vm14 = vcmp.eq.s32.totalorder %v2125_v2, %v2626_v46  ;;  %vm639_vm15 = vcmp.eq.s32.totalorder %v2602_v44, %v2626_v46  ;;  %v1340_v46 = vld [vmem:[%s3000_s8] sm:$0xff] }
  0x7e   : > { %1807 = vmatpush.msk.msra.mxu0 %vm586_vm0, %v2007_v12  ;;  %1823 = vmatpush.msk.msra.mxu1 %vm650_vm1, %v2007_v12  ;;  %vm1114_vm0 = vcmask 130048  }
  0x7f   : > { %1839 = vmatpush.msk.msra.mxu2 %vm587_vm2, %v2007_v12  ;;  %1855 = vmatpush.msk.msra.mxu3 %vm651_vm3, %v2007_v12 }
  0x80   : > { %1808 = vmatpush.msk.msra.mxu0 %vm582_vm4, %v2007_v12  ;;  %1824 = vmatpush.msk.msra.mxu1 %vm646_vm5, %v2007_v12 }
  0x81   : > { %1840 = vmatpush.msk.msra.mxu2 %vm583_vm6, %v2007_v12  ;;  %1856 = vmatpush.msk.msra.mxu3 %vm647_vm7, %v2007_v12 }
  0x82   : > { %1809 = vmatpush.msk.msra.mxu0 %vm578_vm8, %v2007_v12  ;;  %1825 = vmatpush.msk.msra.mxu1 %vm642_vm9, %v2007_v12 }
  0x83   : > { %1841 = vmatpush.msk.msra.mxu2 %vm579_vm10, %v2007_v12  ;;  %1857 = vmatpush.msk.msra.mxu3 %vm643_vm11, %v2007_v12 }
  0x84   : > { %1810 = vmatpush.msk.msra.mxu0 %vm574_vm12, %v2007_v12  ;;  %1826 = vmatpush.msk.msra.mxu1 %vm638_vm13, %v2007_v12 }
  0x85   : > { %1842 = vmatpush.msk.msra.mxu2 %vm575_vm14, %v2007_v12  ;;  %1858 = vmatpush.msk.msra.mxu3 %vm639_vm15, %v2007_v12  ;;  %v2008_v12 = vmov 0  }
  0x86   : > { %1034 = vmatmul.f32.vlgmr.msra.gmra.mxu0 %v2641_v47  ;;  %1057 = vmatmul.f32.vlgmr.msra.gmra.mxu1 %v2648_v48 }
  0x87   : > { %1080 = vmatmul.f32.vlgmr.msra.gmra.mxu2 %v2641_v47  ;;  %1103 = vmatmul.f32.vlgmr.msra.gmra.mxu3 %v2648_v48  ;;  %v1339_v47 = vld [vmem:[%s2999_s7] sm:$0xff] }
  0x88   : > { %1924 = vset.pattern.permute.xlu0 %v2008_v12  ;;  %1925 = vset.pattern.permute.xlu1 %v2008_v12 }
  0x89   : > { %1926 = vset.pattern.permute.xlu2 %v2008_v12  ;;  %1320 = vperm.xlu0 %1924, %v1312_v14  }
  0x8a   : > { %1343 = vperm.xlu1 %1925, %v1340_v46  }
  0x8e   : > { %1037 = vmatmul.f32.gmra.mxu0 %v2703_v49  ;;  %1060 = vmatmul.f32.gmra.mxu1 %v2710_v50 }
  0x8f   : > { %1083 = vmatmul.f32.gmra.mxu2 %v2703_v49  ;;  %1106 = vmatmul.f32.gmra.mxu3 %v2710_v50 }
  0x91   : > { %1315 = vperm.xlu0 %1924, %v1311_v22  }
  0xcb   : > { %v847_v51 = vpop.f32.mrf.mxu0  ;;  %v870_v52 = vpop.f32.mrf.mxu1 }
  0xd2   : > { %v893_v53 = vpop.f32.mrf.mxu2  ;;  %v2871_v54 = vpop.f32.mrf.mxu3 }
  0xd5   : > { %v850_v55 = vpop.f32.mrf.mxu0  ;;  %v873_v56 = vpop.f32.mrf.mxu1 }
  0xdc   : > { %v896_v57 = vpop.f32.mrf.mxu2  ;;  %v919_v58 = vpop.f32.mrf.mxu3 }
  0xdf   : > { %v943_v59 = vpop.f32.mrf.mxu0  ;;  %v966_v60 = vpop.f32.mrf.mxu1 }
  0xe0   : > { %v967_v2 = vadd.f32 %v966_v60, %v943_v59 }
  0xe6   : > { %v989_v61 = vpop.f32.mrf.mxu2  ;;  %v1012_v62 = vpop.f32.mrf.mxu3 }
  0xe7   : > { %v1013_v7 = vadd.f32 %v1012_v62, %v989_v61 }
  0xe9   : > { %v946_v63 = vpop.f32.mrf.mxu0  ;;  %v969_v0 = vpop.f32.mrf.mxu1 }
  0xea   : > { %v970_v3 = vadd.f32 %v969_v0, %v946_v63 }
  0xec   : > { %1135 = vmatpush.msrb.mxu0 %v970_v3 }
  0xee   : > { %1136 = vmatpush.msrb.mxu0 %v967_v2 }
  0xef   : > { %1859 = vmatmul.msk.f32.vlgmr.msrb.gmra.mxu0 %vm1114_vm0, %v1112_v5 }
  0xf0   : > { %v992_v4 = vpop.f32.mrf.mxu2  ;;  %1233 = vmatpush.msra.mxu0 %v850_v55  ;;  %v1015_v6 = vpop.f32.mrf.mxu3  ;;  %v1467_v55 = vld [vmem:[#allocation2] sm:$0x1] }
  0xf1   : > { %v1016_v8 = vadd.f32 %v1015_v6, %v992_v4  ;;  %1470 = vperm.xlu2 %1926, %v1467_v55  }
  0xf2   : > { %1234 = vmatpush.msra.mxu0 %v847_v51 }
  0xf3   : > { %1158 = vmatpush.msrb.mxu1 %v1016_v8 }
  0xf5   : > { %1159 = vmatpush.msrb.mxu1 %v1013_v7 }
  0xf6   : > { %1861 = vmatmul.msk.f32.vlgmr.msrb.gmra.mxu1 %vm1114_vm0, %v1112_v5 }
  0xf7   : > { %1256 = vmatpush.msra.mxu1 %v873_v56  ;;  %1860 = vmatmul.msk.f32.gmra.mxu0 %vm1114_vm0, %v1113_v9 }
  0xf9   : > { %1257 = vmatpush.msra.mxu1 %v870_v52  ;;  %v1433_v52 = vld [vmem:[%s3001_s9] sm:$0xff] }
  0xfa   : > { %1436 = vperm.xlu1 %1925, %v1433_v52  }
  0xfb   : > { %v1321_v30 = vpop.permute.xlu0 %1320 }
  0xfe   : > { %1862 = vmatmul.msk.f32.gmra.mxu1 %vm1114_vm0, %v1113_v9 }
  0xff   : > { %1867 = vmatmul.msk.f32.vlgmr.msra.gmra.mxu0 %vm1114_vm0, %v1110_v10 }
 0x103   : > { %v1035_v11 = vpop.f32.mrf.mxu0  ;;  %v1058_v13 = vpop.f32.mrf.mxu1 }
 0x104   : > { %v1059_v21 = vadd.f32 %v1058_v13, %v1035_v11  ;;  %v1316_v36 = vpop.permute.xlu0 %1315 }
 0x106   : > { %1869 = vmatmul.msk.f32.vlgmr.msra.gmra.mxu1 %vm1114_vm0, %v1110_v10 }
 0x107   : > { %1868 = vmatmul.msk.f32.gmra.mxu0 %vm1114_vm0, %v1111_v15 }
 0x10a   : > { %v1081_v16 = vpop.f32.mrf.mxu2  ;;  %v1104_v17 = vpop.f32.mrf.mxu3 }
 0x10b   : > { %v1038_v18 = vpop.f32.mrf.mxu0  ;;  %v1061_v19 = vpop.f32.mrf.mxu1  ;;  %v1105_v26 = vadd.f32 %v1104_v17, %v1081_v16 }
 0x10c   : > { %v1062_v20 = vadd.f32 %v1061_v19, %v1038_v18 }
 0x10e   : > { %1181 = vmatpush.msrb.mxu2 %v1062_v20  ;;  %1870 = vmatmul.msk.f32.gmra.mxu1 %vm1114_vm0, %v1111_v15 }
 0x110   : > { %1182 = vmatpush.msrb.mxu2 %v1059_v21 }
 0x111   : > { %1863 = vmatmul.msk.f32.vlgmr.msrb.gmra.mxu2 %vm1114_vm0, %v1112_v5 }
 0x112   : > { %v1084_v23 = vpop.f32.mrf.mxu2  ;;  %v1107_v24 = vpop.f32.mrf.mxu3  ;;  %1279 = vmatpush.msra.mxu2 %v896_v57 }
 0x113   : > { %v1108_v25 = vadd.f32 %v1107_v24, %v1084_v23 }
 0x114   : > { %1280 = vmatpush.msra.mxu2 %v893_v53 }
 0x115   : > { %1204 = vmatpush.msrb.mxu3 %v1108_v25 }
 0x117   : > { %1205 = vmatpush.msrb.mxu3 %v1105_v26 }
 0x118   : > { %1865 = vmatmul.msk.f32.vlgmr.msrb.gmra.mxu3 %vm1114_vm0, %v1112_v5 }
 0x119   : > { %1302 = vmatpush.msra.mxu3 %v919_v58  ;;  %1864 = vmatmul.msk.f32.gmra.mxu2 %vm1114_vm0, %v1113_v9 }
 0x11b   : > { %1303 = vmatpush.msra.mxu3 %v2871_v54 }
 0x120   : > { %1866 = vmatmul.msk.f32.gmra.mxu3 %vm1114_vm0, %v1113_v9 }
 0x121   : > { %1871 = vmatmul.msk.f32.vlgmr.msra.gmra.mxu2 %vm1114_vm0, %v1110_v10 }
 0x128   : > { %1873 = vmatmul.msk.f32.vlgmr.msra.gmra.mxu3 %vm1114_vm0, %v1110_v10  ;;  %v1344_v10 = vpop.permute.xlu1 %1343 }
 0x129   : > { %1872 = vmatmul.msk.f32.gmra.mxu2 %vm1114_vm0, %v1111_v15 }
 0x130   : > { %1874 = vmatmul.msk.f32.gmra.mxu3 %vm1114_vm0, %v1111_v15 }
 0x16c   : > { %v1138_v27 = vpop.f32.mrf.mxu0  ;;  %v1437_v16 = vpop.permute.xlu1 %1436 }
 0x173   : > { %v1161_v28 = vpop.f32.mrf.mxu1 }
 0x174   : > { %v1141_v29 = vpop.f32.mrf.mxu0 }
 0x17b   : > { %v1164_v31 = vpop.f32.mrf.mxu1 }
 0x17c   : > { %v1236_v32 = vpop.f32.mrf.mxu0 }
 0x17d   : > { %v1237_v33 = vadd.f32 %v1236_v32, %v1138_v27 }
 0x17f   : > { %v1323_v38 = vadd.f32 %v1316_v36, %v1237_v33 }
 0x181   : > { %v1331_v42 = vmax.f32 %v1323_v38, 0.0 }
 0x183   : > { %v1259_v34 = vpop.f32.mrf.mxu1 }
 0x184   : > { %v1239_v35 = vpop.f32.mrf.mxu0  ;;  %v1260_v40 = vadd.f32 %v1259_v34, %v1161_v28 }
 0x185   : > { %v1240_v37 = vadd.f32 %v1239_v35, %v1141_v29  ;;  %v1471_v29 = vpop.permute.xlu2 %1470 }
 0x186   : > { %v1324_v45 = vadd.f32 %v1316_v36, %v1260_v40  ;;  %v1473_v32 = vperm.slane %v1471_v29, 0 }
 0x187   : > { %v1327_v39 = vadd.f32 %v1321_v30, %v1240_v37 }
 0x188   : > { %v1332_v50 = vmax.f32 %v1324_v45, 0.0 }
 0x189   : > { %v1335_v41 = vmax.f32 %v1327_v39, 0.0 }
 0x18b   : > { %v1262_v43 = vpop.f32.mrf.mxu1  ;;  %1363 = vmatpush.msrb.mxu0 %v1335_v41 }
 0x18c   : > { %v1263_v44 = vadd.f32 %v1262_v43, %v1164_v31 }
 0x18d   : > { %1364 = vmatpush.msrb.mxu0 %v1331_v42 }
 0x18e   : > { %v1328_v48 = vadd.f32 %v1321_v30, %v1263_v44  ;;  %1875 = vmatmul.msk.f32.vlgmr.msrb.gmra.mxu0 %vm1114_vm0, %v1339_v47 }
 0x190   : > { %v1336_v49 = vmax.f32 %v1328_v48, 0.0 }
 0x192   : > { %1383 = vmatpush.msrb.mxu1 %v1336_v49 }
 0x194   : > { %v1184_v51 = vpop.f32.mrf.mxu2  ;;  %1384 = vmatpush.msrb.mxu1 %v1332_v50 }
 0x195   : > { %1876 = vmatmul.msk.f32.vlgmr.msrb.gmra.mxu1 %vm1114_vm0, %v1339_v47 }
 0x19b   : > { %v1207_v53 = vpop.f32.mrf.mxu3 }
 0x19c   : > { %v1187_v54 = vpop.f32.mrf.mxu2 }
 0x1a3   : > { %v1210_v56 = vpop.f32.mrf.mxu3 }
 0x1a4   : > { %v1282_v57 = vpop.f32.mrf.mxu2 }
 0x1a5   : > { %v1283_v58 = vadd.f32 %v1282_v57, %v1184_v51 }
 0x1a7   : > { %v1325_v62 = vadd.f32 %v1316_v36, %v1283_v58 }
 0x1a9   : > { %v1333_v3 = vmax.f32 %v1325_v62, 0.0 }
 0x1ab   : > { %v1305_v59 = vpop.f32.mrf.mxu3 }
 0x1ac   : > { %v1285_v60 = vpop.f32.mrf.mxu2  ;;  %v1306_v2 = vadd.f32 %v1305_v59, %v1207_v53 }
 0x1ad   : > { %v1286_v61 = vadd.f32 %v1285_v60, %v1187_v54 }
 0x1ae   : > { %v1326_v6 = vadd.f32 %v1316_v36, %v1306_v2 }
 0x1af   : > { %v1329_v63 = vadd.f32 %v1321_v30, %v1286_v61 }
 0x1b0   : > { %v1334_v9 = vmax.f32 %v1326_v6, 0.0 }
 0x1b1   : > { %v1337_v0 = vmax.f32 %v1329_v63, 0.0 }
 0x1b3   : > { %v1308_v4 = vpop.f32.mrf.mxu3  ;;  %1403 = vmatpush.msrb.mxu2 %v1337_v0 }
 0x1b4   : > { %v1309_v5 = vadd.f32 %v1308_v4, %v1210_v56 }
 0x1b5   : > { %1404 = vmatpush.msrb.mxu2 %v1333_v3 }
 0x1b6   : > { %v1330_v7 = vadd.f32 %v1321_v30, %v1309_v5  ;;  %1877 = vmatmul.msk.f32.vlgmr.msrb.gmra.mxu2 %vm1114_vm0, %v1339_v47 }
 0x1b8   : > { %v1338_v8 = vmax.f32 %v1330_v7, 0.0 }
 0x1ba   : > { %1423 = vmatpush.msrb.mxu3 %v1338_v8 }
 0x1bc   : > { %1424 = vmatpush.msrb.mxu3 %v1334_v9 }
 0x1bd   : > { %1878 = vmatmul.msk.f32.vlgmr.msrb.gmra.mxu3 %vm1114_vm0, %v1339_v47 }
 0x20b   : > { %v1366_v13 = vpop.f32.mrf.mxu0 }
 0x20c   : > { %v1367_v15 = vadd.f32 %v1366_v13, %v1344_v10 }
 0x20e   : > { %v1429_v17 = vmax.f32 %v1367_v15, 0.0 }
 0x210   : > { %v1439_v19 = vmul.f32 %v1437_v16, %v1429_v17 }
 0x212   : > { %v1386_v11 = vpop.f32.mrf.mxu1  ;;  %v1443_v21 = vrot.slane %v1439_v19, 4 }
 0x213   : > { %v1387_v12 = vadd.f32 %v1386_v11, %v1344_v10 }
 0x214   : > { %v1444_v23 = vadd.f32 %v1443_v21, %v1439_v19 }
 0x215   : > { %v1430_v14 = vmax.f32 %v1387_v12, 0.0 }
 0x216   : > { %v1445_v25 = vrot.slane %v1444_v23, 2 }
 0x217   : > { %v1440_v18 = vmul.f32 %v1437_v16, %v1430_v14 }
 0x218   : > { %v1446_v27 = vadd.f32 %v1445_v25, %v1444_v23 }
 0x219   : > { %v1449_v20 = vrot.slane %v1440_v18, 4 }
 0x21a   : > { %v1447_v30 = vrot.slane %v1446_v27, 1 }
 0x21b   : > { %v1450_v22 = vadd.f32 %v1449_v20, %v1440_v18 }
 0x21c   : > { %v1448_v33 = vadd.f32 %v1447_v30, %v1446_v27 }
 0x21d   : > { %v1451_v24 = vrot.slane %v1450_v22, 2 }
 0x21e   : > { %v1474_v38 = vadd.f32 %v1473_v32, %v1448_v33 }
 0x21f   : > { %v1452_v26 = vadd.f32 %v1451_v24, %v1450_v22 }
 0x220   : > { %v1478_v42 = vsub.f32 0.0, %v1474_v38 }
 0x221   : > { %v1453_v28 = vrot.slane %v1452_v26, 1 }
 0x222   : > { %v1482_v49 = vmul.f32 1.442695, %v1478_v42 }
 0x223   : > { %v1454_v31 = vadd.f32 %v1453_v28, %v1452_v26 }
 0x225   : > { %v1475_v34 = vadd.f32 %v1473_v32, %v1454_v31 }
 0x227   : > { %v1479_v39 = vsub.f32 0.0, %v1475_v34 }
 0x229   : > { %v1484_v43 = vmul.f32 1.442695, %v1479_v39 }
 0x22b   : > { %1927 = vpow2.f32 %v1484_v43 }
 0x22c   : > { %1929 = vpow2.f32 %v1482_v49 }
 0x231   : > { %v1928_v55 = vpop.eup %1927 }
 0x232   : > { %v1491_v59 = vadd.f32 1.0, %v1928_v55  ;;  %v1930_v61 = vpop.eup %1929 }
 0x233   : > { %v1490_v2 = vadd.f32 1.0, %v1930_v61 }
 0x234   : > { %1931 = vrcp.f32 %v1491_v59  ;;  %vm1514_vm1 = vweird.f32 %v1491_v59  ;;  %v1518_v22 = vand.u32 2147483647, %v1491_v59  ;;  %v1520_v23 = vand.u32 2147483648, %v1491_v59 }
 0x235   : > { %vm1499_vm3 = vweird.f32 %v1490_v2  ;;  %v1505_v27 = vand.u32 2147483648, %v1490_v2  ;;  %v1503_v29 = vand.u32 2147483647, %v1490_v2 }
 0x236   : > { %vm2932_vm7 = vcmp.eq.f32.partialorder %v1518_v22, 8.507059e+37  ;;  %v1521_v34 = vor.u32 1.1754944e-38, %v1520_v23 }
 0x237   : > { %vm1504_vm12 = vcmp.eq.f32.partialorder %v1503_v29, 8.507059e+37 }
 0x239   : > { %v1406_v35 = vpop.f32.mrf.mxu2 }
 0x23a   : > { %v1407_v36 = vadd.f32 %v1406_v35, %v1344_v10  ;;  %v1932_v6 = vpop.eup %1931 }
 0x23b   : > { %v1510_v11 = vmul.f32 %v1932_v6, %v1491_v59  ;;  %vm1515_vm2 = vweird.f32 %v1932_v6 }
 0x23c   : > { %v1431_v37 = vmax.f32 %v1407_v36, 0.0  ;;  %vm2926_vm5 = vmor %vm1514_vm1, %vm1515_vm2  ;;  %vm1561_vm1 = vcmask 1040384   ;;  %vm1563_vm2 = vcmask 1042434  }
 0x23d   : > { %v1511_v14 = vsub.f32 1.0, %v1510_v11 }
 0x23e   : > { %v1441_v40 = vmul.f32 %v1437_v16, %v1431_v37 }
 0x23f   : > { %v1512_v19 = vmul.f32 %v1932_v6, %v1511_v14 }
 0x240   : > { %v1455_v41 = vrot.slane %v1441_v40, 4  ;;  %v1426_v44 = vpop.f32.mrf.mxu3 }
 0x241   : > { %v1427_v45 = vadd.f32 %v1426_v44, %v1344_v10  ;;  %v1513_v25 = vadd.f32 %v1932_v6, %v1512_v19 }
 0x242   : > { %v1456_v46 = vadd.f32 %v1455_v41, %v1441_v40 }
 0x243   : > { %v1432_v47 = vmax.f32 %v1427_v45, 0.0  ;;  %v1517_v37 = vsel %vm2926_vm5, %v1932_v6, %v1513_v25  ;;  %v1506_v45 = vor.u32 1.1754944e-38, %v1505_v27 }
 0x244   : > { %v1457_v48 = vrot.slane %v1456_v46, 2 }
 0x245   : > { %v1442_v50 = vmul.f32 %v1437_v16, %v1432_v47 }
 0x246   : > { %v1458_v51 = vadd.f32 %v1457_v48, %v1456_v46  ;;  %v1522_v46 = vsel %vm2932_vm7, %v1521_v34, %v1517_v37 }
 0x247   : > { %v1461_v52 = vrot.slane %v1442_v50, 4 }
 0x248   : > { %v1459_v53 = vrot.slane %v1458_v51, 1 }
 0x249   : > { %v1462_v54 = vadd.f32 %v1461_v52, %v1442_v50 }
 0x24a   : > { %v1460_v56 = vadd.f32 %v1459_v53, %v1458_v51  ;;  %v1558_v53 = vrot.slane %v1522_v46, 7 }
 0x24b   : > { %v1463_v57 = vrot.slane %v1462_v54, 2 }
 0x24c   : > { %v1476_v58 = vadd.f32 %v1473_v32, %v1460_v56 }
 0x24d   : > { %v1464_v60 = vadd.f32 %v1463_v57, %v1462_v54 }
 0x24e   : > { %v1480_v62 = vsub.f32 0.0, %v1476_v58 }
 0x24f   : > { %v1465_v63 = vrot.slane %v1464_v60, 1 }
 0x250   : > { %v1486_v0 = vmul.f32 1.442695, %v1480_v62 }
 0x251   : > { %v1466_v3 = vadd.f32 %v1465_v63, %v1464_v60 }
 0x252   : > { %1933 = vpow2.f32 %v1486_v0 }
 0x253   : > { %v1477_v4 = vadd.f32 %v1473_v32, %v1466_v3  ;;  %1935 = vrcp.f32 %v1490_v2 }
 0x255   : > { %v1481_v5 = vsub.f32 0.0, %v1477_v4 }
 0x257   : > { %v1488_v7 = vmul.f32 1.442695, %v1481_v5 }
 0x258   : > { %v1934_v8 = vpop.eup %1933 }
 0x259   : > { %v1492_v9 = vadd.f32 1.0, %v1934_v8  ;;  %1937 = vpow2.f32 %v1488_v7  ;;  %v2921_v10 = vpop.eup %1935 }
 0x25a   : > { %v1495_v12 = vmul.f32 %v2921_v10, %v1490_v2  ;;  %vm1500_vm4 = vweird.f32 %v2921_v10 }
 0x25b   : > { %1939 = vrcp.f32 %v1492_v9  ;;  %v1535_v35 = vand.u32 2147483648, %v1492_v9  ;;  %vm2936_vm8 = vmor %vm1499_vm3, %vm1500_vm4  ;;  %vm1529_vm9 = vweird.f32 %v1492_v9  ;;  %v1533_v38 = vand.u32 2147483647, %v1492_v9 }
 0x25c   : > { %v1496_v18 = vsub.f32 1.0, %v1495_v12  ;;  %vm1565_vm3 = vcmask 1041408   ;;  %vm1570_vm4 = vcmp.lt.s32.totalorder %v403_v1, 512 }
 0x25d   : > { %v1536_v47 = vor.u32 1.1754944e-38, %v1535_v35  ;;  %vm1534_vm13 = vcmp.eq.f32.partialorder %v1533_v38, 8.507059e+37 }
 0x25e   : > { %v1497_v21 = vmul.f32 %v2921_v10, %v1496_v18 }
 0x25f   : > { %v1938_v13 = vpop.eup %1937 }
 0x260   : > { %v1493_v15 = vadd.f32 1.0, %v1938_v13  ;;  %v1498_v32 = vadd.f32 %v2921_v10, %v1497_v21 }
 0x261   : > { %v1940_v16 = vpop.eup %1939 }
 0x262   : > { %v1525_v17 = vmul.f32 %v1940_v16, %v1492_v9  ;;  %1941 = vrcp.f32 %v1493_v15  ;;  %vm1530_vm6 = vweird.f32 %v1940_v16  ;;  %v1550_v41 = vand.u32 2147483648, %v1493_v15 }
 0x263   : > { %vm2946_vm10 = vmor %vm1529_vm9, %vm1530_vm6  ;;  %v1548_v44 = vand.u32 2147483647, %v1493_v15  ;;  %v1502_v48 = vsel %vm2936_vm8, %v2921_v10, %v1498_v32  ;;  %vm1544_vm14 = vweird.f32 %v1493_v15 }
 0x264   : > { %v1526_v20 = vsub.f32 1.0, %v1525_v17  ;;  %v1551_v51 = vor.u32 1.1754944e-38, %v1550_v41  ;;  %v1507_v54 = vsel %vm1504_vm12, %v1506_v45, %v1502_v48 }
 0x265   : > { %vm1549_vm0 = vcmp.eq.f32.partialorder %v1548_v44, 8.507059e+37  ;;  %v1562_v58 = vsel %vm1561_vm1, %v1507_v54, %v1558_v53 }
 0x266   : > { %v1527_v24 = vmul.f32 %v1940_v16, %v1526_v20 }
 0x268   : > { %v1942_v26 = vpop.eup %1941  ;;  %v1528_v30 = vadd.f32 %v1940_v16, %v1527_v24 }
 0x269   : > { %v1540_v31 = vmul.f32 %v1942_v26, %v1493_v15  ;;  %vm1545_vm11 = vweird.f32 %v1942_v26 }
 0x26a   : > { %v1532_v42 = vsel %vm2946_vm10, %v1940_v16, %v1528_v30  ;;  %vm1546_vm15 = vmor %vm1544_vm14, %vm1545_vm11 }
 0x26b   : > { %v1541_v39 = vsub.f32 1.0, %v1540_v31  ;;  %v1537_v50 = vsel %vm1534_vm13, %v1536_v47, %v1532_v42 }
 0x26c   : > { %v1559_v56 = vrot.slane %v1537_v50, 6 }
 0x26d   : > { %v1542_v43 = vmul.f32 %v1942_v26, %v1541_v39 }
 0x26f   : > { %v1543_v49 = vadd.f32 %v1942_v26, %v1542_v43 }
 0x271   : > { %v1547_v52 = vsel %vm1546_vm15, %v1942_v26, %v1543_v49 }
 0x272   : > { %v1552_v55 = vsel %vm1549_vm0, %v1551_v51, %v1547_v52 }
 0x273   : > { %v1560_v57 = vrot.slane %v1552_v55, 5 }
 0x275   : > { %v1564_v59 = vsel %vm1563_vm2, %v1559_v56, %v1560_v57 }
 0x276   : > { %v1566_v60 = vsel %vm1565_vm3, %v1562_v58, %v1564_v59 }
 0x277   : > { %1572 = vst.msk [vmem:[%s392_s26] sm:$0xf] %vm1570_vm4, %v1566_v60 }
 0x278   : > { %1970 = shalt.err (!%p1967_p3)
}
 0x279   : > { %1883 = dma.vmem_to_hbm [thread:$0]  (%p2110_p5), %s1587_s30, 64, %s1589_s12, %s1574_s13  }
 0x27a PF: > { %p1889_p4 = scmp.ge.s32.totalorder %s2005_s22, 2  ;;  %s1600_s16 = sand.u32 1, %s1993_s19  }
 0x27b   : > { %s1601_s26 = scalar_lea.sflag [#allocation4], %s1600_s16 }
 0x27c   : > { %p1886_p7 = pnand %p1889_p4, %p2114_p6 }
 0x27e   : > { %p1887_p8 = pneg %p1886_p7 }
 0x280   : > { %1988 = dma.done.wait (%p1887_p8), %s1601_s26, 64  }
 0x281   : > { %1990 = vsyncadd (%p1887_p8), %s1601_s26, 4294967232  ;;  %p23_p9 = scmp.ge.s32.totalorder %s2097_s24, 4   ;;  %s3014_s19 = smov %s1997_s20 }
 0x282   : > { %s3015_s20 = smov %s2001_s21  ;;  %s3016_s21 = smov %s2108_s27 }
 0x283   : > { %s3017_s22 = smov %s2097_s24  ;;  %25 = sbr.rel (!%p23_p9) target bundleno = 6 (0x6), region = 102 }
 0x288   :  { %1607 = vsyncpa [#allocation4], 1 }
 0x289   :  { %1609 = vsyncpa [#allocation4 + $0x1], 1 }

</bundles_post_ra>
